<compile_context>
chip_gen: v6e
topology: v6e:2x2x1
jax: 0.10.0
libtpu: 0.0.40
codegen_flags: <defaults>
</compile_context>

<pallas_src>
import numpy as np
import jax
import jax.numpy as jnp
from jax import lax
from jax.experimental import pallas as pl
from jax.experimental.pallas import tpu as pltpu


def _round_up(x, m):
    return ((x + m - 1) // m) * m


def staterep_kernel(embeds_ref, lens_ref, w_ih_ref, w_hh_ref, b_ref,
                    fc_w_ref, fc_b_ref, out_ref, gx_ref, h_ref, c_ref):
    """One time-chunk of the LSTM recurrence.

    embeds_ref : (Tc*Bp, E)   bf16, time-major chunk (row t*Bp + b)
    lens_ref   : (Bp, 1)      int32 valid lengths (0 for padded batch rows)
    w_ih_ref   : (E, 4*Hp)    bf16  (gate k in columns [k*Hp, k*Hp + H))
    w_hh_ref   : (Hp, 4*Hp)   bf16
    b_ref      : (1, 4*Hp)    f32   (b_ih + b_hh, gate-block padded with zeros)
    fc_w_ref   : (Hp, K)      bf16
    fc_b_ref   : (1, K)       f32
    out_ref    : (Bp, K)      f32   (written on the last chunk only)
    gx_ref     : (Tc*Bp, 4Hp) bf16 scratch (per-chunk input projection)
    h_ref/c_ref: (Bp, Hp)     f32 scratch, persistent across grid steps
    """
    chunk = pl.program_id(0)
    n_chunks = pl.num_programs(0)
    TcB = embeds_ref.shape[0]
    Bp = out_ref.shape[0]
    Hp = w_hh_ref.shape[0]
    Tc = TcB // Bp

    @pl.when(chunk == 0)
    def _():
        h_ref[...] = jnp.zeros_like(h_ref)
        c_ref[...] = jnp.zeros_like(c_ref)

    # ---- Phase 1: one MXU matmul for the x-projection of this whole chunk.
    # Stored in bf16 (halves scratch + store/load traffic); bias is added in
    # f32 inside step() so gate precision is unchanged.
    gx_ref[...] = jnp.dot(
        embeds_ref[...], w_ih_ref[...],
        preferred_element_type=jnp.float32).astype(gx_ref.dtype)

    # ---- Hoist loop-invariant loads out of the recurrence.
    w_hh = w_hh_ref[...]          # (Hp, 4Hp) bf16
    bias = b_ref[...]             # (1, 4Hp)  f32
    lens = lens_ref[...]          # (Bp, 1)   int32
    t0 = chunk * Tc               # absolute timestep of this chunk's first row

    def step(t, carry):
        h, c = carry                                          # (Bp, Hp) f32
        base = pl.multiple_of(t * Bp, Bp)
        gates = (gx_ref[pl.ds(base, Bp), :].astype(jnp.float32)
                 + jnp.dot(h.astype(w_hh.dtype), w_hh,
                           preferred_element_type=jnp.float32)
                 + bias)
        # sigmoid(x) == 0.5*(1 + tanh(0.5*x)): one EUP push per gate.
        i_g = 0.5 * (1.0 + jnp.tanh(0.5 * gates[:, 0 * Hp:1 * Hp]))
        f_g = 0.5 * (1.0 + jnp.tanh(0.5 * gates[:, 1 * Hp:2 * Hp]))
        g_g = jnp.tanh(gates[:, 2 * Hp:3 * Hp])
        o_g = 0.5 * (1.0 + jnp.tanh(0.5 * gates[:, 3 * Hp:4 * Hp]))
        c_new = f_g * c + i_g * g_g
        h_new = o_g * jnp.tanh(c_new)
        keep = (t0 + t) < lens          # (Bp,1); emulates pack_padded_sequence
        return (jnp.where(keep, h_new, h), jnp.where(keep, c_new, c))

    unroll = True if Tc <= 8 else 4
    h_T, c_T = lax.fori_loop(0, Tc, step, (h_ref[...], c_ref[...]),
                             unroll=unroll)
    h_ref[...] = h_T
    c_ref[...] = c_T

    @pl.when(chunk == n_chunks - 1)
    def _():
        out_ref[...] = (
            jnp.dot(h_T.astype(fc_w_ref.dtype), fc_w_ref[...],
                    preferred_element_type=jnp.float32)
            + fc_b_ref[...])


def staterep_forward(embeds_2d, lens_col, w_ih_p, w_hh_p, b_p, fc_w_p, fc_b,
                     Bp, Tc):
    TB, E = embeds_2d.shape
    Hp = w_hh_p.shape[0]
    K = fc_w_p.shape[1]
    n_chunks = TB // (Tc * Bp)

    # VMEM budget from the actual buffers (double-buffered embeds chunk, bf16
    # gx scratch, weights, h/c state) with generous margin.
    emb_bytes = 2 * Tc * Bp * E * 2
    gx_bytes = Tc * Bp * 4 * Hp * 2
    hc_bytes = 2 * Bp * Hp * 4
    w_bytes = (E * 4 * Hp + Hp * 4 * Hp + Hp * K) * 2 + (4 * Hp + K + Bp + Bp * K) * 4
    total = emb_bytes + gx_bytes + hc_bytes + w_bytes
    vmem_limit = min(max(2 * total + (4 << 20), 32 << 20), 64 << 20)

    def full_spec(shape):
        return pl.BlockSpec(shape, lambda c: (0,) * len(shape))

    return pl.pallas_call(
        staterep_kernel,
        out_shape=jax.ShapeDtypeStruct((Bp, K), jnp.float32),
        grid_spec=pltpu.PrefetchScalarGridSpec(
            num_scalar_prefetch=0,
            grid=(n_chunks,),
            in_specs=[
                pl.BlockSpec((Tc * Bp, E), lambda c: (c, 0)),   # embeds chunk
                full_spec((Bp, 1)),                             # lens
                full_spec((E, 4 * Hp)),                         # W_ih
                full_spec((Hp, 4 * Hp)),                        # W_hh
                full_spec((1, 4 * Hp)),                         # bias
                full_spec((Hp, K)),                             # fc_w
                full_spec((1, K)),                              # fc_b
            ],
            out_specs=pl.BlockSpec((Bp, K), lambda c: (0, 0)),
            scratch_shapes=[
                pltpu.VMEM((Tc * Bp, 4 * Hp), jnp.bfloat16),    # gx (per chunk)
                pltpu.VMEM((Bp, Hp), jnp.float32),              # h state
                pltpu.VMEM((Bp, Hp), jnp.float32),              # c state
            ]),
        compiler_params=pltpu.CompilerParams(
            dimension_semantics=("arbitrary",),
            vmem_limit_bytes=int(vmem_limit)),
    )(embeds_2d, lens_col, w_ih_p, w_hh_p, b_p, fc_w_p, fc_b)


class StateRepJax:
    """JAX/Pallas re-implementation of the PyTorch StateRep module."""

    def __init__(self, movie_id_list, embedding_dim, hidden_dim, output_dim_k,
                 num_layers=1, dropout=0.0, key=None):
        assert num_layers == 1  # TODO(synk): multi-layer LSTM stacking not implemented
        self.output_dim_k = output_dim_k
        self.padding_token = "<PAD>"
        self.movie_ids = list(movie_id_list) + [self.padding_token]
        self.movie_idx = {m: i for i, m in enumerate(self.movie_ids)}
        self.padding_id = self.movie_idx[self.padding_token]
        vocab_size = len(self.movie_ids)
        E, H, K = embedding_dim, hidden_dim, output_dim_k
        self.H = H
        self.Hp = _round_up(H, 128)   # lane-aligned per-gate block width

        if key is None:
            key = jax.random.PRNGKey(0)
        k_emb, k_wih, k_whh, k_bih, k_bhh, k_fcw, k_fcb = jax.random.split(key, 7)

        emb = 0.1 * jax.random.normal(k_emb, (vocab_size, E), jnp.float32)
        # padding_idx row is zero (as in nn.Embedding(padding_idx=...))
        self.embedding = emb.at[self.padding_id].set(0.0)

        s = 1.0 / np.sqrt(H)
        # stored transposed for the kernel: (E,4H), (H,4H); gate order i,f,g,o
        self.w_ih = jax.random.uniform(k_wih, (E, 4 * H), jnp.float32, -s, s)
        self.w_hh = jax.random.uniform(k_whh, (H, 4 * H), jnp.float32, -s, s)
        b_ih = jax.random.uniform(k_bih, (4 * H,), jnp.float32, -s, s)
        b_hh = jax.random.uniform(k_bhh, (4 * H,), jnp.float32, -s, s)
        self.b = (b_ih + b_hh).reshape(1, 4 * H)

        self.fc_w = jax.random.uniform(k_fcw, (H, K), jnp.float32, -s, s)
        self.fc_b = jax.random.uniform(k_fcb, (1, K), jnp.float32, -s, s)

        # ---- Padded / bf16 weights for the kernel (built once) ----
        # Gate columns beyond H are ZERO — this keeps the padded lanes of h/c
        # exactly zero through the recurrence (preserve if editing).
        Hp = self.Hp

        def pad_gate_cols(w):
            out = jnp.zeros((w.shape[0], 4 * Hp), w.dtype)
            for g in range(4):
                out = out.at[:, g * Hp:g * Hp + H].set(w[:, g * H:(g + 1) * H])
            return out

        self.w_ih_p = pad_gate_cols(self.w_ih).astype(jnp.bfloat16)      # (E, 4Hp)
        w_hh_pc = pad_gate_cols(self.w_hh)                               # (H, 4Hp)
        self.w_hh_p = (jnp.zeros((Hp, 4 * Hp), jnp.float32)
                       .at[:H].set(w_hh_pc).astype(jnp.bfloat16))        # (Hp, 4Hp)
        self.b_p = pad_gate_cols(self.b)                                 # (1, 4Hp) f32
        self.fc_w_p = (jnp.zeros((Hp, K), jnp.float32)
                       .at[:H].set(self.fc_w).astype(jnp.bfloat16))      # (Hp, K)

    def _tokenize(self, movie_sequences):
        if len(movie_sequences) == 0:
            movie_sequences = [[]]
        # Mirror the PyTorch preprocessing exactly: an empty sequence becomes the
        # padding-token *string*, which is then iterated character-wise (each char
        # maps to padding_id), just like the reference module does.
        processed = [seq if seq else self.padding_token for seq in movie_sequences]
        int_seqs = [[self.movie_idx.get(m, self.padding_id) for m in seq]
                    for seq in processed]
        lengths = [len(s) for s in int_seqs]
        return int_seqs, lengths

    def forward(self, movie_sequences):
        int_seqs, lengths = self._tokenize(movie_sequences)
        B = len(int_seqs)
        T = max(lengths)

        # Bucket T to a power of two (>= 8) and Bp to a multiple of 16 so shape
        # jitter across calls does not recompile the pallas_call.
        T_bucket = max(8, int(pl.next_power_of_2(T)))
        Tc = min(T_bucket, 32)            # time-chunk size (T_bucket % Tc == 0)
        Bp = max(16, _round_up(B, 16))    # bf16 sublane packing

        padded = [s + [self.padding_id] * (T_bucket - len(s)) for s in int_seqs]
        padded = padded + [[self.padding_id] * T_bucket] * (Bp - B)
        lens_p = lengths + [0] * (Bp - B)     # padded rows never update state

        ids = jnp.asarray(padded, dtype=jnp.int32)                 # (Bp, T_bucket)
        lens_col = jnp.asarray(lens_p, dtype=jnp.int32)[:, None]   # (Bp, 1)

        embeds = jnp.take(self.embedding, ids, axis=0)             # (Bp, Tb, E) glue gather
        E = embeds.shape[-1]
        embeds_2d = (jnp.transpose(embeds, (1, 0, 2))              # time-major
                     .reshape(T_bucket * Bp, E).astype(jnp.bfloat16))

        out = staterep_forward(embeds_2d, lens_col, self.w_ih_p, self.w_hh_p,
                               self.b_p, self.fc_w_p, self.fc_b, Bp, Tc)
        out = out[:B]
        assert out.shape == (B, self.output_dim_k)
        return out

    def reference_forward(self, movie_sequences):
        """Pure-JAX float32 reference (same semantics) for sanity checking."""
        int_seqs, lengths = self._tokenize(movie_sequences)
        T = max(lengths)
        padded = [s + [self.padding_id] * (T - len(s)) for s in int_seqs]
        ids = jnp.asarray(padded, dtype=jnp.int32)
        x = jnp.take(self.embedding, ids, axis=0)                  # (B, T, E)
        B = x.shape[0]
        H = self.H
        lens = jnp.asarray(lengths, dtype=jnp.int32)
        h = jnp.zeros((B, H), jnp.float32)
        c = jnp.zeros((B, H), jnp.float32)
        for t in range(T):
            gates = x[:, t] @ self.w_ih + h @ self.w_hh + self.b
            i_g = jax.nn.sigmoid(gates[:, 0 * H:1 * H])
            f_g = jax.nn.sigmoid(gates[:, 1 * H:2 * H])
            g_g = jnp.tanh(gates[:, 2 * H:3 * H])
            o_g = jax.nn.sigmoid(gates[:, 3 * H:4 * H])
            c_new = f_g * c + i_g * g_g
            h_new = o_g * jnp.tanh(c_new)
            keep = (t < lens)[:, None]
            h = jnp.where(keep, h_new, h)
            c = jnp.where(keep, c_new, c)
        return h @ self.fc_w + self.fc_b


if __name__ == "__main__":
    movie_id_list = [f"tt{100 + i}" for i in range(20)]
    model = StateRepJax(movie_id_list, embedding_dim=16, hidden_dim=32,
                        output_dim_k=8, key=jax.random.PRNGKey(0))

    # --- Test 1: small batch of variable-length sequences (single time chunk).
    movie_sequences = [
        ["tt100", "tt101", "tt102", "tt103", "tt104", "tt105"],
        ["tt110", "tt111", "tt112"],
        [],                                  # empty -> padding-token string (PyTorch quirk)
        ["tt115", "tt119", "unknown_id"],    # unknown ids map to padding_id
    ]
    out = jax.block_until_ready(model.forward(movie_sequences))
    assert out.shape == (4, 8)
    assert bool(jnp.all(jnp.isfinite(out)))
    ref = jax.block_until_ready(model.reference_forward(movie_sequences))
    np.testing.assert_allclose(np.asarray(out), np.asarray(ref), rtol=0.0, atol=2e-2)

    # --- Test 2: longer sequences to exercise the multi-chunk (grid > 1) path.
    long_sequences = [
        [movie_id_list[i % 20] for i in range(40)],
        [movie_id_list[(3 * i) % 20] for i in range(25)],
        [movie_id_list[(7 * i) % 20] for i in range(5)],
    ]
    out2 = jax.block_until_ready(model.forward(long_sequences))
    assert out2.shape == (3, 8)
    assert bool(jnp.all(jnp.isfinite(out2)))
    ref2 = jax.block_until_ready(model.reference_forward(long_sequences))
    np.testing.assert_allclose(np.asarray(out2), np.asarray(ref2), rtol=0.0, atol=3e-2)

    print("KERNEL_OK")
</pallas_src>

<mosaic_0001>
module attributes {stable_mosaic.version = 11 : i64} {
  func.func @staterep_kernel(%arg0: i32, %arg1: memref<128x16xbf16, #tpu.memory_space<vmem>>, %arg2: memref<16x1xi32, #tpu.memory_space<vmem>>, %arg3: memref<16x512xbf16, #tpu.memory_space<vmem>>, %arg4: memref<128x512xbf16, #tpu.memory_space<vmem>>, %arg5: memref<1x512xf32, #tpu.memory_space<vmem>>, %arg6: memref<128x8xbf16, #tpu.memory_space<vmem>>, %arg7: memref<1x8xf32, #tpu.memory_space<vmem>>, %arg8: memref<16x8xf32, #tpu.memory_space<vmem>>, %arg9: memref<128x512xbf16, #tpu.memory_space<vmem>>, %arg10: memref<16x128xf32, #tpu.memory_space<vmem>>, %arg11: memref<16x128xf32, #tpu.memory_space<vmem>>) attributes {dimension_semantics = [#tpu.dimension_semantics<arbitrary>], iteration_bounds = array<i64: 1>, scalar_prefetch = 0 : i64, scratch_operands = 3 : i64, tpu.core_type = #tpu.core_type<tc>, window_params = [{transform_indices = @transform_0, window_bounds = array<i64: 128, 16>}, {pipeline_mode = #tpu.pipeline_mode<synchronous>, transform_indices = @transform_1, window_bounds = array<i64: 16, 1>}, {pipeline_mode = #tpu.pipeline_mode<synchronous>, transform_indices = @transform_2, window_bounds = array<i64: 16, 512>}, {pipeline_mode = #tpu.pipeline_mode<synchronous>, transform_indices = @transform_3, window_bounds = array<i64: 128, 512>}, {pipeline_mode = #tpu.pipeline_mode<synchronous>, transform_indices = @transform_4, window_bounds = array<i64: 1, 512>}, {pipeline_mode = #tpu.pipeline_mode<synchronous>, transform_indices = @transform_5, window_bounds = array<i64: 128, 8>}, {pipeline_mode = #tpu.pipeline_mode<synchronous>, transform_indices = @transform_6, window_bounds = array<i64: 1, 8>}, {pipeline_mode = #tpu.pipeline_mode<synchronous>, transform_indices = @transform_7, window_bounds = array<i64: 16, 8>}]} {
    %c0_i32 = arith.constant 0 : i32
    %0 = arith.cmpi eq, %arg0, %c0_i32 : i32
    %1 = arith.extui %0 : i1 to i32
    %c0_i32_0 = arith.constant 0 : i32
    %2 = arith.cmpi ne, %1, %c0_i32_0 : i32
    scf.if %2 {
      %cst_119 = arith.constant 0.000000e+00 : f32
      %419 = vector.broadcast %cst_119 : f32 to vector<16x128xf32>
      %c0_120 = arith.constant 0 : index
      %c0_121 = arith.constant 0 : index
      %420 = vector.load %arg10[%c0_120, %c0_121] : memref<16x128xf32, #tpu.memory_space<vmem>>, vector<16x128xf32>
      tpu.vector_store %arg10[%c0_120, %c0_121], %419 {strides = array<i32>} : memref<16x128xf32, #tpu.memory_space<vmem>>, vector<16x128xf32>,
      %cst_122 = arith.constant 0.000000e+00 : f32
      %421 = vector.broadcast %cst_122 : f32 to vector<16x128xf32>
      %c0_123 = arith.constant 0 : index
      %c0_124 = arith.constant 0 : index
      %422 = vector.load %arg11[%c0_123, %c0_124] : memref<16x128xf32, #tpu.memory_space<vmem>>, vector<16x128xf32>
      tpu.vector_store %arg11[%c0_123, %c0_124], %421 {strides = array<i32>} : memref<16x128xf32, #tpu.memory_space<vmem>>, vector<16x128xf32>,
    } else {
    }
    %c0 = arith.constant 0 : index
    %c0_1 = arith.constant 0 : index
    %3 = vector.load %arg1[%c0, %c0_1] : memref<128x16xbf16, #tpu.memory_space<vmem>>, vector<128x16xbf16>
    %c0_2 = arith.constant 0 : index
    %c0_3 = arith.constant 0 : index
    %4 = vector.load %arg3[%c0_2, %c0_3] : memref<16x512xbf16, #tpu.memory_space<vmem>>, vector<16x512xbf16>
    %cst = arith.constant dense<0.000000e+00> : vector<128x512xf32>
    %5 = tpu.matmul %3, %4, %cst {dimension_numbers = #tpu.dot_dimension_numbers<[1], [0], [0], [1], [0, 0, 1, 1], [], []>} : vector<128x16xbf16>, vector<16x512xbf16>, vector<128x512xf32> -> vector<128x512xf32>
    %6 = arith.truncf %5 : vector<128x512xf32> to vector<128x512xbf16>
    %c0_4 = arith.constant 0 : index
    %c0_5 = arith.constant 0 : index
    %7 = vector.load %arg9[%c0_4, %c0_5] : memref<128x512xbf16, #tpu.memory_space<vmem>>, vector<128x512xbf16>
    tpu.vector_store %arg9[%c0_4, %c0_5], %6 {strides = array<i32>} : memref<128x512xbf16, #tpu.memory_space<vmem>>, vector<128x512xbf16>,
    %c0_6 = arith.constant 0 : index
    %c0_7 = arith.constant 0 : index
    %8 = vector.load %arg4[%c0_6, %c0_7] : memref<128x512xbf16, #tpu.memory_space<vmem>>, vector<128x512xbf16>
    %c0_8 = arith.constant 0 : index
    %c0_9 = arith.constant 0 : index
    %9 = vector.load %arg5[%c0_8, %c0_9] : memref<1x512xf32, #tpu.memory_space<vmem>>, vector<1x512xf32>
    %c0_10 = arith.constant 0 : index
    %c0_11 = arith.constant 0 : index
    %10 = vector.load %arg2[%c0_10, %c0_11] : memref<16x1xi32, #tpu.memory_space<vmem>>, vector<16x1xi32>
    %c8_i32 = arith.constant 8 : i32
    %11 = arith.muli %arg0, %c8_i32 : i32
    %c0_12 = arith.constant 0 : index
    %c0_13 = arith.constant 0 : index
    %12 = vector.load %arg10[%c0_12, %c0_13] : memref<16x128xf32, #tpu.memory_space<vmem>>, vector<16x128xf32>
    %c0_14 = arith.constant 0 : index
    %c0_15 = arith.constant 0 : index
    %13 = vector.load %arg11[%c0_14, %c0_15] : memref<16x128xf32, #tpu.memory_space<vmem>>, vector<16x128xf32>
    %c0_i32_16 = arith.constant 0 : i32
    %c16_i32 = arith.constant 16 : i32
    %14 = arith.muli %c0_i32_16, %c16_i32 : i32
    %15 = tpu.assume_multiple %14, 16 : i32
    %16 = arith.index_cast %15 : i32 to index
    %c0_17 = arith.constant 0 : index
    %17 = vector.load %arg9[%16, %c0_17] : memref<128x512xbf16, #tpu.memory_space<vmem>>, vector<16x512xbf16>
    %18 = arith.extf %17 : vector<16x512xbf16> to vector<16x512xf32>
    %19 = arith.truncf %12 : vector<16x128xf32> to vector<16x128xbf16>
    %cst_18 = arith.constant dense<0.000000e+00> : vector<16x512xf32>
    %20 = tpu.matmul %19, %8, %cst_18 {dimension_numbers = #tpu.dot_dimension_numbers<[1], [0], [0], [1], [0, 0, 1, 1], [], []>} : vector<16x128xbf16>, vector<128x512xbf16>, vector<16x512xf32> -> vector<16x512xf32>
    %21 = arith.addf %18, %20 : vector<16x512xf32>
    %22 = vector.broadcast %9 : vector<1x512xf32> to vector<16x512xf32>
    %23 = arith.addf %21, %22 : vector<16x512xf32>
    %24 = vector.extract_strided_slice %23 {offsets = [0, 0], sizes = [16, 128], strides = [1, 1]} : vector<16x512xf32> to vector<16x128xf32>
    %cst_19 = arith.constant 5.000000e-01 : f32
    %25 = vector.broadcast %cst_19 : f32 to vector<16x128xf32>
    %26 = arith.mulf %25, %24 : vector<16x128xf32>
    %27 = math.tanh %26 : vector<16x128xf32>
    %cst_20 = arith.constant 1.000000e+00 : f32
    %28 = vector.broadcast %cst_20 : f32 to vector<16x128xf32>
    %29 = arith.addf %28, %27 : vector<16x128xf32>
    %cst_21 = arith.constant 5.000000e-01 : f32
    %30 = vector.broadcast %cst_21 : f32 to vector<16x128xf32>
    %31 = arith.mulf %30, %29 : vector<16x128xf32>
    %32 = vector.extract_strided_slice %23 {offsets = [0, 128], sizes = [16, 128], strides = [1, 1]} : vector<16x512xf32> to vector<16x128xf32>
    %cst_22 = arith.constant 5.000000e-01 : f32
    %33 = vector.broadcast %cst_22 : f32 to vector<16x128xf32>
    %34 = arith.mulf %33, %32 : vector<16x128xf32>
    %35 = math.tanh %34 : vector<16x128xf32>
    %cst_23 = arith.constant 1.000000e+00 : f32
    %36 = vector.broadcast %cst_23 : f32 to vector<16x128xf32>
    %37 = arith.addf %36, %35 : vector<16x128xf32>
    %cst_24 = arith.constant 5.000000e-01 : f32
    %38 = vector.broadcast %cst_24 : f32 to vector<16x128xf32>
    %39 = arith.mulf %38, %37 : vector<16x128xf32>
    %40 = vector.extract_strided_slice %23 {offsets = [0, 256], sizes = [16, 128], strides = [1, 1]} : vector<16x512xf32> to vector<16x128xf32>
    %41 = math.tanh %40 : vector<16x128xf32>
    %42 = vector.extract_strided_slice %23 {offsets = [0, 384], sizes = [16, 128], strides = [1, 1]} : vector<16x512xf32> to vector<16x128xf32>
    %cst_25 = arith.constant 5.000000e-01 : f32
    %43 = vector.broadcast %cst_25 : f32 to vector<16x128xf32>
    %44 = arith.mulf %43, %42 : vector<16x128xf32>
    %45 = math.tanh %44 : vector<16x128xf32>
    %cst_26 = arith.constant 1.000000e+00 : f32
    %46 = vector.broadcast %cst_26 : f32 to vector<16x128xf32>
    %47 = arith.addf %46, %45 : vector<16x128xf32>
    %cst_27 = arith.constant 5.000000e-01 : f32
    %48 = vector.broadcast %cst_27 : f32 to vector<16x128xf32>
    %49 = arith.mulf %48, %47 : vector<16x128xf32>
    %50 = arith.mulf %39, %13 : vector<16x128xf32>
    %51 = arith.mulf %31, %41 : vector<16x128xf32>
    %52 = arith.addf %50, %51 : vector<16x128xf32>
    %53 = math.tanh %52 : vector<16x128xf32>
    %54 = arith.mulf %49, %53 : vector<16x128xf32>
    %55 = arith.addi %11, %c0_i32_16 : i32
    %56 = vector.broadcast %55 : i32 to vector<16x1xi32>
    %57 = arith.cmpi slt, %56, %10 : vector<16x1xi32>
    %58 = vector.shape_cast %57 : vector<16x1xi1> to vector<16x1xi1>
    %59 = vector.broadcast %58 : vector<16x1xi1> to vector<16x128xi1>
    %60 = arith.select %59, %54, %12 : vector<16x128xi1>, vector<16x128xf32>
    %61 = vector.shape_cast %57 : vector<16x1xi1> to vector<16x1xi1>
    %62 = vector.broadcast %61 : vector<16x1xi1> to vector<16x128xi1>
    %63 = arith.select %62, %52, %13 : vector<16x128xi1>, vector<16x128xf32>
    %c1_i32 = arith.constant 1 : i32
    %c16_i32_28 = arith.constant 16 : i32
    %64 = arith.muli %c1_i32, %c16_i32_28 : i32
    %65 = tpu.assume_multiple %64, 16 : i32
    %66 = arith.index_cast %65 : i32 to index
    %c0_29 = arith.constant 0 : index
    %67 = vector.load %arg9[%66, %c0_29] : memref<128x512xbf16, #tpu.memory_space<vmem>>, vector<16x512xbf16>
    %68 = arith.extf %67 : vector<16x512xbf16> to vector<16x512xf32>
    %69 = arith.truncf %60 : vector<16x128xf32> to vector<16x128xbf16>
    %cst_30 = arith.constant dense<0.000000e+00> : vector<16x512xf32>
    %70 = tpu.matmul %69, %8, %cst_30 {dimension_numbers = #tpu.dot_dimension_numbers<[1], [0], [0], [1], [0, 0, 1, 1], [], []>} : vector<16x128xbf16>, vector<128x512xbf16>, vector<16x512xf32> -> vector<16x512xf32>
    %71 = arith.addf %68, %70 : vector<16x512xf32>
    %72 = vector.broadcast %9 : vector<1x512xf32> to vector<16x512xf32>
    %73 = arith.addf %71, %72 : vector<16x512xf32>
    %74 = vector.extract_strided_slice %73 {offsets = [0, 0], sizes = [16, 128], strides = [1, 1]} : vector<16x512xf32> to vector<16x128xf32>
    %cst_31 = arith.constant 5.000000e-01 : f32
    %75 = vector.broadcast %cst_31 : f32 to vector<16x128xf32>
    %76 = arith.mulf %75, %74 : vector<16x128xf32>
    %77 = math.tanh %76 : vector<16x128xf32>
    %cst_32 = arith.constant 1.000000e+00 : f32
    %78 = vector.broadcast %cst_32 : f32 to vector<16x128xf32>
    %79 = arith.addf %78, %77 : vector<16x128xf32>
    %cst_33 = arith.constant 5.000000e-01 : f32
    %80 = vector.broadcast %cst_33 : f32 to vector<16x128xf32>
    %81 = arith.mulf %80, %79 : vector<16x128xf32>
    %82 = vector.extract_strided_slice %73 {offsets = [0, 128], sizes = [16, 128], strides = [1, 1]} : vector<16x512xf32> to vector<16x128xf32>
    %cst_34 = arith.constant 5.000000e-01 : f32
    %83 = vector.broadcast %cst_34 : f32 to vector<16x128xf32>
    %84 = arith.mulf %83, %82 : vector<16x128xf32>
    %85 = math.tanh %84 : vector<16x128xf32>
    %cst_35 = arith.constant 1.000000e+00 : f32
    %86 = vector.broadcast %cst_35 : f32 to vector<16x128xf32>
    %87 = arith.addf %86, %85 : vector<16x128xf32>
    %cst_36 = arith.constant 5.000000e-01 : f32
    %88 = vector.broadcast %cst_36 : f32 to vector<16x128xf32>
    %89 = arith.mulf %88, %87 : vector<16x128xf32>
    %90 = vector.extract_strided_slice %73 {offsets = [0, 256], sizes = [16, 128], strides = [1, 1]} : vector<16x512xf32> to vector<16x128xf32>
    %91 = math.tanh %90 : vector<16x128xf32>
    %92 = vector.extract_strided_slice %73 {offsets = [0, 384], sizes = [16, 128], strides = [1, 1]} : vector<16x512xf32> to vector<16x128xf32>
    %cst_37 = arith.constant 5.000000e-01 : f32
    %93 = vector.broadcast %cst_37 : f32 to vector<16x128xf32>
    %94 = arith.mulf %93, %92 : vector<16x128xf32>
    %95 = math.tanh %94 : vector<16x128xf32>
    %cst_38 = arith.constant 1.000000e+00 : f32
    %96 = vector.broadcast %cst_38 : f32 to vector<16x128xf32>
    %97 = arith.addf %96, %95 : vector<16x128xf32>
    %cst_39 = arith.constant 5.000000e-01 : f32
    %98 = vector.broadcast %cst_39 : f32 to vector<16x128xf32>
    %99 = arith.mulf %98, %97 : vector<16x128xf32>
    %100 = arith.mulf %89, %63 : vector<16x128xf32>
    %101 = arith.mulf %81, %91 : vector<16x128xf32>
    %102 = arith.addf %100, %101 : vector<16x128xf32>
    %103 = math.tanh %102 : vector<16x128xf32>
    %104 = arith.mulf %99, %103 : vector<16x128xf32>
    %105 = arith.addi %11, %c1_i32 : i32
    %106 = vector.broadcast %105 : i32 to vector<16x1xi32>
    %107 = arith.cmpi slt, %106, %10 : vector<16x1xi32>
    %108 = vector.shape_cast %107 : vector<16x1xi1> to vector<16x1xi1>
    %109 = vector.broadcast %108 : vector<16x1xi1> to vector<16x128xi1>
    %110 = arith.select %109, %104, %60 : vector<16x128xi1>, vector<16x128xf32>
    %111 = vector.shape_cast %107 : vector<16x1xi1> to vector<16x1xi1>
    %112 = vector.broadcast %111 : vector<16x1xi1> to vector<16x128xi1>
    %113 = arith.select %112, %102, %63 : vector<16x128xi1>, vector<16x128xf32>
    %c2_i32 = arith.constant 2 : i32
    %c16_i32_40 = arith.constant 16 : i32
    %114 = arith.muli %c2_i32, %c16_i32_40 : i32
    %115 = tpu.assume_multiple %114, 16 : i32
    %116 = arith.index_cast %115 : i32 to index
    %c0_41 = arith.constant 0 : index
    %117 = vector.load %arg9[%116, %c0_41] : memref<128x512xbf16, #tpu.memory_space<vmem>>, vector<16x512xbf16>
    %118 = arith.extf %117 : vector<16x512xbf16> to vector<16x512xf32>
    %119 = arith.truncf %110 : vector<16x128xf32> to vector<16x128xbf16>
    %cst_42 = arith.constant dense<0.000000e+00> : vector<16x512xf32>
    %120 = tpu.matmul %119, %8, %cst_42 {dimension_numbers = #tpu.dot_dimension_numbers<[1], [0], [0], [1], [0, 0, 1, 1], [], []>} : vector<16x128xbf16>, vector<128x512xbf16>, vector<16x512xf32> -> vector<16x512xf32>
    %121 = arith.addf %118, %120 : vector<16x512xf32>
    %122 = vector.broadcast %9 : vector<1x512xf32> to vector<16x512xf32>
    %123 = arith.addf %121, %122 : vector<16x512xf32>
    %124 = vector.extract_strided_slice %123 {offsets = [0, 0], sizes = [16, 128], strides = [1, 1]} : vector<16x512xf32> to vector<16x128xf32>
    %cst_43 = arith.constant 5.000000e-01 : f32
    %125 = vector.broadcast %cst_43 : f32 to vector<16x128xf32>
    %126 = arith.mulf %125, %124 : vector<16x128xf32>
    %127 = math.tanh %126 : vector<16x128xf32>
    %cst_44 = arith.constant 1.000000e+00 : f32
    %128 = vector.broadcast %cst_44 : f32 to vector<16x128xf32>
    %129 = arith.addf %128, %127 : vector<16x128xf32>
    %cst_45 = arith.constant 5.000000e-01 : f32
    %130 = vector.broadcast %cst_45 : f32 to vector<16x128xf32>
    %131 = arith.mulf %130, %129 : vector<16x128xf32>
    %132 = vector.extract_strided_slice %123 {offsets = [0, 128], sizes = [16, 128], strides = [1, 1]} : vector<16x512xf32> to vector<16x128xf32>
    %cst_46 = arith.constant 5.000000e-01 : f32
    %133 = vector.broadcast %cst_46 : f32 to vector<16x128xf32>
    %134 = arith.mulf %133, %132 : vector<16x128xf32>
    %135 = math.tanh %134 : vector<16x128xf32>
    %cst_47 = arith.constant 1.000000e+00 : f32
    %136 = vector.broadcast %cst_47 : f32 to vector<16x128xf32>
    %137 = arith.addf %136, %135 : vector<16x128xf32>
    %cst_48 = arith.constant 5.000000e-01 : f32
    %138 = vector.broadcast %cst_48 : f32 to vector<16x128xf32>
    %139 = arith.mulf %138, %137 : vector<16x128xf32>
    %140 = vector.extract_strided_slice %123 {offsets = [0, 256], sizes = [16, 128], strides = [1, 1]} : vector<16x512xf32> to vector<16x128xf32>
    %141 = math.tanh %140 : vector<16x128xf32>
    %142 = vector.extract_strided_slice %123 {offsets = [0, 384], sizes = [16, 128], strides = [1, 1]} : vector<16x512xf32> to vector<16x128xf32>
    %cst_49 = arith.constant 5.000000e-01 : f32
    %143 = vector.broadcast %cst_49 : f32 to vector<16x128xf32>
    %144 = arith.mulf %143, %142 : vector<16x128xf32>
    %145 = math.tanh %144 : vector<16x128xf32>
    %cst_50 = arith.constant 1.000000e+00 : f32
    %146 = vector.broadcast %cst_50 : f32 to vector<16x128xf32>
    %147 = arith.addf %146, %145 : vector<16x128xf32>
    %cst_51 = arith.constant 5.000000e-01 : f32
    %148 = vector.broadcast %cst_51 : f32 to vector<16x128xf32>
    %149 = arith.mulf %148, %147 : vector<16x128xf32>
    %150 = arith.mulf %139, %113 : vector<16x128xf32>
    %151 = arith.mulf %131, %141 : vector<16x128xf32>
    %152 = arith.addf %150, %151 : vector<16x128xf32>
    %153 = math.tanh %152 : vector<16x128xf32>
    %154 = arith.mulf %149, %153 : vector<16x128xf32>
    %155 = arith.addi %11, %c2_i32 : i32
    %156 = vector.broadcast %155 : i32 to vector<16x1xi32>
    %157 = arith.cmpi slt, %156, %10 : vector<16x1xi32>
    %158 = vector.shape_cast %157 : vector<16x1xi1> to vector<16x1xi1>
    %159 = vector.broadcast %158 : vector<16x1xi1> to vector<16x128xi1>
    %160 = arith.select %159, %154, %110 : vector<16x128xi1>, vector<16x128xf32>
    %161 = vector.shape_cast %157 : vector<16x1xi1> to vector<16x1xi1>
    %162 = vector.broadcast %161 : vector<16x1xi1> to vector<16x128xi1>
    %163 = arith.select %162, %152, %113 : vector<16x128xi1>, vector<16x128xf32>
    %c3_i32 = arith.constant 3 : i32
    %c16_i32_52 = arith.constant 16 : i32
    %164 = arith.muli %c3_i32, %c16_i32_52 : i32
    %165 = tpu.assume_multiple %164, 16 : i32
    %166 = arith.index_cast %165 : i32 to index
    %c0_53 = arith.constant 0 : index
    %167 = vector.load %arg9[%166, %c0_53] : memref<128x512xbf16, #tpu.memory_space<vmem>>, vector<16x512xbf16>
    %168 = arith.extf %167 : vector<16x512xbf16> to vector<16x512xf32>
    %169 = arith.truncf %160 : vector<16x128xf32> to vector<16x128xbf16>
    %cst_54 = arith.constant dense<0.000000e+00> : vector<16x512xf32>
    %170 = tpu.matmul %169, %8, %cst_54 {dimension_numbers = #tpu.dot_dimension_numbers<[1], [0], [0], [1], [0, 0, 1, 1], [], []>} : vector<16x128xbf16>, vector<128x512xbf16>, vector<16x512xf32> -> vector<16x512xf32>
    %171 = arith.addf %168, %170 : vector<16x512xf32>
    %172 = vector.broadcast %9 : vector<1x512xf32> to vector<16x512xf32>
    %173 = arith.addf %171, %172 : vector<16x512xf32>
    %174 = vector.extract_strided_slice %173 {offsets = [0, 0], sizes = [16, 128], strides = [1, 1]} : vector<16x512xf32> to vector<16x128xf32>
    %cst_55 = arith.constant 5.000000e-01 : f32
    %175 = vector.broadcast %cst_55 : f32 to vector<16x128xf32>
    %176 = arith.mulf %175, %174 : vector<16x128xf32>
    %177 = math.tanh %176 : vector<16x128xf32>
    %cst_56 = arith.constant 1.000000e+00 : f32
    %178 = vector.broadcast %cst_56 : f32 to vector<16x128xf32>
    %179 = arith.addf %178, %177 : vector<16x128xf32>
    %cst_57 = arith.constant 5.000000e-01 : f32
    %180 = vector.broadcast %cst_57 : f32 to vector<16x128xf32>
    %181 = arith.mulf %180, %179 : vector<16x128xf32>
    %182 = vector.extract_strided_slice %173 {offsets = [0, 128], sizes = [16, 128], strides = [1, 1]} : vector<16x512xf32> to vector<16x128xf32>
    %cst_58 = arith.constant 5.000000e-01 : f32
    %183 = vector.broadcast %cst_58 : f32 to vector<16x128xf32>
    %184 = arith.mulf %183, %182 : vector<16x128xf32>
    %185 = math.tanh %184 : vector<16x128xf32>
    %cst_59 = arith.constant 1.000000e+00 : f32
    %186 = vector.broadcast %cst_59 : f32 to vector<16x128xf32>
    %187 = arith.addf %186, %185 : vector<16x128xf32>
    %cst_60 = arith.constant 5.000000e-01 : f32
    %188 = vector.broadcast %cst_60 : f32 to vector<16x128xf32>
    %189 = arith.mulf %188, %187 : vector<16x128xf32>
    %190 = vector.extract_strided_slice %173 {offsets = [0, 256], sizes = [16, 128], strides = [1, 1]} : vector<16x512xf32> to vector<16x128xf32>
    %191 = math.tanh %190 : vector<16x128xf32>
    %192 = vector.extract_strided_slice %173 {offsets = [0, 384], sizes = [16, 128], strides = [1, 1]} : vector<16x512xf32> to vector<16x128xf32>
    %cst_61 = arith.constant 5.000000e-01 : f32
    %193 = vector.broadcast %cst_61 : f32 to vector<16x128xf32>
    %194 = arith.mulf %193, %192 : vector<16x128xf32>
    %195 = math.tanh %194 : vector<16x128xf32>
    %cst_62 = arith.constant 1.000000e+00 : f32
    %196 = vector.broadcast %cst_62 : f32 to vector<16x128xf32>
    %197 = arith.addf %196, %195 : vector<16x128xf32>
    %cst_63 = arith.constant 5.000000e-01 : f32
    %198 = vector.broadcast %cst_63 : f32 to vector<16x128xf32>
    %199 = arith.mulf %198, %197 : vector<16x128xf32>
    %200 = arith.mulf %189, %163 : vector<16x128xf32>
    %201 = arith.mulf %181, %191 : vector<16x128xf32>
    %202 = arith.addf %200, %201 : vector<16x128xf32>
    %203 = math.tanh %202 : vector<16x128xf32>
    %204 = arith.mulf %199, %203 : vector<16x128xf32>
    %205 = arith.addi %11, %c3_i32 : i32
    %206 = vector.broadcast %205 : i32 to vector<16x1xi32>
    %207 = arith.cmpi slt, %206, %10 : vector<16x1xi32>
    %208 = vector.shape_cast %207 : vector<16x1xi1> to vector<16x1xi1>
    %209 = vector.broadcast %208 : vector<16x1xi1> to vector<16x128xi1>
    %210 = arith.select %209, %204, %160 : vector<16x128xi1>, vector<16x128xf32>
    %211 = vector.shape_cast %207 : vector<16x1xi1> to vector<16x1xi1>
    %212 = vector.broadcast %211 : vector<16x1xi1> to vector<16x128xi1>
    %213 = arith.select %212, %202, %163 : vector<16x128xi1>, vector<16x128xf32>
    %c4_i32 = arith.constant 4 : i32
    %c16_i32_64 = arith.constant 16 : i32
    %214 = arith.muli %c4_i32, %c16_i32_64 : i32
    %215 = tpu.assume_multiple %214, 16 : i32
    %216 = arith.index_cast %215 : i32 to index
    %c0_65 = arith.constant 0 : index
    %217 = vector.load %arg9[%216, %c0_65] : memref<128x512xbf16, #tpu.memory_space<vmem>>, vector<16x512xbf16>
    %218 = arith.extf %217 : vector<16x512xbf16> to vector<16x512xf32>
    %219 = arith.truncf %210 : vector<16x128xf32> to vector<16x128xbf16>
    %cst_66 = arith.constant dense<0.000000e+00> : vector<16x512xf32>
    %220 = tpu.matmul %219, %8, %cst_66 {dimension_numbers = #tpu.dot_dimension_numbers<[1], [0], [0], [1], [0, 0, 1, 1], [], []>} : vector<16x128xbf16>, vector<128x512xbf16>, vector<16x512xf32> -> vector<16x512xf32>
    %221 = arith.addf %218, %220 : vector<16x512xf32>
    %222 = vector.broadcast %9 : vector<1x512xf32> to vector<16x512xf32>
    %223 = arith.addf %221, %222 : vector<16x512xf32>
    %224 = vector.extract_strided_slice %223 {offsets = [0, 0], sizes = [16, 128], strides = [1, 1]} : vector<16x512xf32> to vector<16x128xf32>
    %cst_67 = arith.constant 5.000000e-01 : f32
    %225 = vector.broadcast %cst_67 : f32 to vector<16x128xf32>
    %226 = arith.mulf %225, %224 : vector<16x128xf32>
    %227 = math.tanh %226 : vector<16x128xf32>
    %cst_68 = arith.constant 1.000000e+00 : f32
    %228 = vector.broadcast %cst_68 : f32 to vector<16x128xf32>
    %229 = arith.addf %228, %227 : vector<16x128xf32>
    %cst_69 = arith.constant 5.000000e-01 : f32
    %230 = vector.broadcast %cst_69 : f32 to vector<16x128xf32>
    %231 = arith.mulf %230, %229 : vector<16x128xf32>
    %232 = vector.extract_strided_slice %223 {offsets = [0, 128], sizes = [16, 128], strides = [1, 1]} : vector<16x512xf32> to vector<16x128xf32>
    %cst_70 = arith.constant 5.000000e-01 : f32
    %233 = vector.broadcast %cst_70 : f32 to vector<16x128xf32>
    %234 = arith.mulf %233, %232 : vector<16x128xf32>
    %235 = math.tanh %234 : vector<16x128xf32>
    %cst_71 = arith.constant 1.000000e+00 : f32
    %236 = vector.broadcast %cst_71 : f32 to vector<16x128xf32>
    %237 = arith.addf %236, %235 : vector<16x128xf32>
    %cst_72 = arith.constant 5.000000e-01 : f32
    %238 = vector.broadcast %cst_72 : f32 to vector<16x128xf32>
    %239 = arith.mulf %238, %237 : vector<16x128xf32>
    %240 = vector.extract_strided_slice %223 {offsets = [0, 256], sizes = [16, 128], strides = [1, 1]} : vector<16x512xf32> to vector<16x128xf32>
    %241 = math.tanh %240 : vector<16x128xf32>
    %242 = vector.extract_strided_slice %223 {offsets = [0, 384], sizes = [16, 128], strides = [1, 1]} : vector<16x512xf32> to vector<16x128xf32>
    %cst_73 = arith.constant 5.000000e-01 : f32
    %243 = vector.broadcast %cst_73 : f32 to vector<16x128xf32>
    %244 = arith.mulf %243, %242 : vector<16x128xf32>
    %245 = math.tanh %244 : vector<16x128xf32>
    %cst_74 = arith.constant 1.000000e+00 : f32
    %246 = vector.broadcast %cst_74 : f32 to vector<16x128xf32>
    %247 = arith.addf %246, %245 : vector<16x128xf32>
    %cst_75 = arith.constant 5.000000e-01 : f32
    %248 = vector.broadcast %cst_75 : f32 to vector<16x128xf32>
    %249 = arith.mulf %248, %247 : vector<16x128xf32>
    %250 = arith.mulf %239, %213 : vector<16x128xf32>
    %251 = arith.mulf %231, %241 : vector<16x128xf32>
    %252 = arith.addf %250, %251 : vector<16x128xf32>
    %253 = math.tanh %252 : vector<16x128xf32>
    %254 = arith.mulf %249, %253 : vector<16x128xf32>
    %255 = arith.addi %11, %c4_i32 : i32
    %256 = vector.broadcast %255 : i32 to vector<16x1xi32>
    %257 = arith.cmpi slt, %256, %10 : vector<16x1xi32>
    %258 = vector.shape_cast %257 : vector<16x1xi1> to vector<16x1xi1>
    %259 = vector.broadcast %258 : vector<16x1xi1> to vector<16x128xi1>
    %260 = arith.select %259, %254, %210 : vector<16x128xi1>, vector<16x128xf32>
    %261 = vector.shape_cast %257 : vector<16x1xi1> to vector<16x1xi1>
    %262 = vector.broadcast %261 : vector<16x1xi1> to vector<16x128xi1>
    %263 = arith.select %262, %252, %213 : vector<16x128xi1>, vector<16x128xf32>
    %c5_i32 = arith.constant 5 : i32
    %c16_i32_76 = arith.constant 16 : i32
    %264 = arith.muli %c5_i32, %c16_i32_76 : i32
    %265 = tpu.assume_multiple %264, 16 : i32
    %266 = arith.index_cast %265 : i32 to index
    %c0_77 = arith.constant 0 : index
    %267 = vector.load %arg9[%266, %c0_77] : memref<128x512xbf16, #tpu.memory_space<vmem>>, vector<16x512xbf16>
    %268 = arith.extf %267 : vector<16x512xbf16> to vector<16x512xf32>
    %269 = arith.truncf %260 : vector<16x128xf32> to vector<16x128xbf16>
    %cst_78 = arith.constant dense<0.000000e+00> : vector<16x512xf32>
    %270 = tpu.matmul %269, %8, %cst_78 {dimension_numbers = #tpu.dot_dimension_numbers<[1], [0], [0], [1], [0, 0, 1, 1], [], []>} : vector<16x128xbf16>, vector<128x512xbf16>, vector<16x512xf32> -> vector<16x512xf32>
    %271 = arith.addf %268, %270 : vector<16x512xf32>
    %272 = vector.broadcast %9 : vector<1x512xf32> to vector<16x512xf32>
    %273 = arith.addf %271, %272 : vector<16x512xf32>
    %274 = vector.extract_strided_slice %273 {offsets = [0, 0], sizes = [16, 128], strides = [1, 1]} : vector<16x512xf32> to vector<16x128xf32>
    %cst_79 = arith.constant 5.000000e-01 : f32
    %275 = vector.broadcast %cst_79 : f32 to vector<16x128xf32>
    %276 = arith.mulf %275, %274 : vector<16x128xf32>
    %277 = math.tanh %276 : vector<16x128xf32>
    %cst_80 = arith.constant 1.000000e+00 : f32
    %278 = vector.broadcast %cst_80 : f32 to vector<16x128xf32>
    %279 = arith.addf %278, %277 : vector<16x128xf32>
    %cst_81 = arith.constant 5.000000e-01 : f32
    %280 = vector.broadcast %cst_81 : f32 to vector<16x128xf32>
    %281 = arith.mulf %280, %279 : vector<16x128xf32>
    %282 = vector.extract_strided_slice %273 {offsets = [0, 128], sizes = [16, 128], strides = [1, 1]} : vector<16x512xf32> to vector<16x128xf32>
    %cst_82 = arith.constant 5.000000e-01 : f32
    %283 = vector.broadcast %cst_82 : f32 to vector<16x128xf32>
    %284 = arith.mulf %283, %282 : vector<16x128xf32>
    %285 = math.tanh %284 : vector<16x128xf32>
    %cst_83 = arith.constant 1.000000e+00 : f32
    %286 = vector.broadcast %cst_83 : f32 to vector<16x128xf32>
    %287 = arith.addf %286, %285 : vector<16x128xf32>
    %cst_84 = arith.constant 5.000000e-01 : f32
    %288 = vector.broadcast %cst_84 : f32 to vector<16x128xf32>
    %289 = arith.mulf %288, %287 : vector<16x128xf32>
    %290 = vector.extract_strided_slice %273 {offsets = [0, 256], sizes = [16, 128], strides = [1, 1]} : vector<16x512xf32> to vector<16x128xf32>
    %291 = math.tanh %290 : vector<16x128xf32>
    %292 = vector.extract_strided_slice %273 {offsets = [0, 384], sizes = [16, 128], strides = [1, 1]} : vector<16x512xf32> to vector<16x128xf32>
    %cst_85 = arith.constant 5.000000e-01 : f32
    %293 = vector.broadcast %cst_85 : f32 to vector<16x128xf32>
    %294 = arith.mulf %293, %292 : vector<16x128xf32>
    %295 = math.tanh %294 : vector<16x128xf32>
    %cst_86 = arith.constant 1.000000e+00 : f32
    %296 = vector.broadcast %cst_86 : f32 to vector<16x128xf32>
    %297 = arith.addf %296, %295 : vector<16x128xf32>
    %cst_87 = arith.constant 5.000000e-01 : f32
    %298 = vector.broadcast %cst_87 : f32 to vector<16x128xf32>
    %299 = arith.mulf %298, %297 : vector<16x128xf32>
    %300 = arith.mulf %289, %263 : vector<16x128xf32>
    %301 = arith.mulf %281, %291 : vector<16x128xf32>
    %302 = arith.addf %300, %301 : vector<16x128xf32>
    %303 = math.tanh %302 : vector<16x128xf32>
    %304 = arith.mulf %299, %303 : vector<16x128xf32>
    %305 = arith.addi %11, %c5_i32 : i32
    %306 = vector.broadcast %305 : i32 to vector<16x1xi32>
    %307 = arith.cmpi slt, %306, %10 : vector<16x1xi32>
    %308 = vector.shape_cast %307 : vector<16x1xi1> to vector<16x1xi1>
    %309 = vector.broadcast %308 : vector<16x1xi1> to vector<16x128xi1>
    %310 = arith.select %309, %304, %260 : vector<16x128xi1>, vector<16x128xf32>
    %311 = vector.shape_cast %307 : vector<16x1xi1> to vector<16x1xi1>
    %312 = vector.broadcast %311 : vector<16x1xi1> to vector<16x128xi1>
    %313 = arith.select %312, %302, %263 : vector<16x128xi1>, vector<16x128xf32>
    %c6_i32 = arith.constant 6 : i32
    %c16_i32_88 = arith.constant 16 : i32
    %314 = arith.muli %c6_i32, %c16_i32_88 : i32
    %315 = tpu.assume_multiple %314, 16 : i32
    %316 = arith.index_cast %315 : i32 to index
    %c0_89 = arith.constant 0 : index
    %317 = vector.load %arg9[%316, %c0_89] : memref<128x512xbf16, #tpu.memory_space<vmem>>, vector<16x512xbf16>
    %318 = arith.extf %317 : vector<16x512xbf16> to vector<16x512xf32>
    %319 = arith.truncf %310 : vector<16x128xf32> to vector<16x128xbf16>
    %cst_90 = arith.constant dense<0.000000e+00> : vector<16x512xf32>
    %320 = tpu.matmul %319, %8, %cst_90 {dimension_numbers = #tpu.dot_dimension_numbers<[1], [0], [0], [1], [0, 0, 1, 1], [], []>} : vector<16x128xbf16>, vector<128x512xbf16>, vector<16x512xf32> -> vector<16x512xf32>
    %321 = arith.addf %318, %320 : vector<16x512xf32>
    %322 = vector.broadcast %9 : vector<1x512xf32> to vector<16x512xf32>
    %323 = arith.addf %321, %322 : vector<16x512xf32>
    %324 = vector.extract_strided_slice %323 {offsets = [0, 0], sizes = [16, 128], strides = [1, 1]} : vector<16x512xf32> to vector<16x128xf32>
    %cst_91 = arith.constant 5.000000e-01 : f32
    %325 = vector.broadcast %cst_91 : f32 to vector<16x128xf32>
    %326 = arith.mulf %325, %324 : vector<16x128xf32>
    %327 = math.tanh %326 : vector<16x128xf32>
    %cst_92 = arith.constant 1.000000e+00 : f32
    %328 = vector.broadcast %cst_92 : f32 to vector<16x128xf32>
    %329 = arith.addf %328, %327 : vector<16x128xf32>
    %cst_93 = arith.constant 5.000000e-01 : f32
    %330 = vector.broadcast %cst_93 : f32 to vector<16x128xf32>
    %331 = arith.mulf %330, %329 : vector<16x128xf32>
    %332 = vector.extract_strided_slice %323 {offsets = [0, 128], sizes = [16, 128], strides = [1, 1]} : vector<16x512xf32> to vector<16x128xf32>
    %cst_94 = arith.constant 5.000000e-01 : f32
    %333 = vector.broadcast %cst_94 : f32 to vector<16x128xf32>
    %334 = arith.mulf %333, %332 : vector<16x128xf32>
    %335 = math.tanh %334 : vector<16x128xf32>
    %cst_95 = arith.constant 1.000000e+00 : f32
    %336 = vector.broadcast %cst_95 : f32 to vector<16x128xf32>
    %337 = arith.addf %336, %335 : vector<16x128xf32>
    %cst_96 = arith.constant 5.000000e-01 : f32
    %338 = vector.broadcast %cst_96 : f32 to vector<16x128xf32>
    %339 = arith.mulf %338, %337 : vector<16x128xf32>
    %340 = vector.extract_strided_slice %323 {offsets = [0, 256], sizes = [16, 128], strides = [1, 1]} : vector<16x512xf32> to vector<16x128xf32>
    %341 = math.tanh %340 : vector<16x128xf32>
    %342 = vector.extract_strided_slice %323 {offsets = [0, 384], sizes = [16, 128], strides = [1, 1]} : vector<16x512xf32> to vector<16x128xf32>
    %cst_97 = arith.constant 5.000000e-01 : f32
    %343 = vector.broadcast %cst_97 : f32 to vector<16x128xf32>
    %344 = arith.mulf %343, %342 : vector<16x128xf32>
    %345 = math.tanh %344 : vector<16x128xf32>
    %cst_98 = arith.constant 1.000000e+00 : f32
    %346 = vector.broadcast %cst_98 : f32 to vector<16x128xf32>
    %347 = arith.addf %346, %345 : vector<16x128xf32>
    %cst_99 = arith.constant 5.000000e-01 : f32
    %348 = vector.broadcast %cst_99 : f32 to vector<16x128xf32>
    %349 = arith.mulf %348, %347 : vector<16x128xf32>
    %350 = arith.mulf %339, %313 : vector<16x128xf32>
    %351 = arith.mulf %331, %341 : vector<16x128xf32>
    %352 = arith.addf %350, %351 : vector<16x128xf32>
    %353 = math.tanh %352 : vector<16x128xf32>
    %354 = arith.mulf %349, %353 : vector<16x128xf32>
    %355 = arith.addi %11, %c6_i32 : i32
    %356 = vector.broadcast %355 : i32 to vector<16x1xi32>
    %357 = arith.cmpi slt, %356, %10 : vector<16x1xi32>
    %358 = vector.shape_cast %357 : vector<16x1xi1> to vector<16x1xi1>
    %359 = vector.broadcast %358 : vector<16x1xi1> to vector<16x128xi1>
    %360 = arith.select %359, %354, %310 : vector<16x128xi1>, vector<16x128xf32>
    %361 = vector.shape_cast %357 : vector<16x1xi1> to vector<16x1xi1>
    %362 = vector.broadcast %361 : vector<16x1xi1> to vector<16x128xi1>
    %363 = arith.select %362, %352, %313 : vector<16x128xi1>, vector<16x128xf32>
    %c7_i32 = arith.constant 7 : i32
    %c16_i32_100 = arith.constant 16 : i32
    %364 = arith.muli %c7_i32, %c16_i32_100 : i32
    %365 = tpu.assume_multiple %364, 16 : i32
    %366 = arith.index_cast %365 : i32 to index
    %c0_101 = arith.constant 0 : index
    %367 = vector.load %arg9[%366, %c0_101] : memref<128x512xbf16, #tpu.memory_space<vmem>>, vector<16x512xbf16>
    %368 = arith.extf %367 : vector<16x512xbf16> to vector<16x512xf32>
    %369 = arith.truncf %360 : vector<16x128xf32> to vector<16x128xbf16>
    %cst_102 = arith.constant dense<0.000000e+00> : vector<16x512xf32>
    %370 = tpu.matmul %369, %8, %cst_102 {dimension_numbers = #tpu.dot_dimension_numbers<[1], [0], [0], [1], [0, 0, 1, 1], [], []>} : vector<16x128xbf16>, vector<128x512xbf16>, vector<16x512xf32> -> vector<16x512xf32>
    %371 = arith.addf %368, %370 : vector<16x512xf32>
    %372 = vector.broadcast %9 : vector<1x512xf32> to vector<16x512xf32>
    %373 = arith.addf %371, %372 : vector<16x512xf32>
    %374 = vector.extract_strided_slice %373 {offsets = [0, 0], sizes = [16, 128], strides = [1, 1]} : vector<16x512xf32> to vector<16x128xf32>
    %cst_103 = arith.constant 5.000000e-01 : f32
    %375 = vector.broadcast %cst_103 : f32 to vector<16x128xf32>
    %376 = arith.mulf %375, %374 : vector<16x128xf32>
    %377 = math.tanh %376 : vector<16x128xf32>
    %cst_104 = arith.constant 1.000000e+00 : f32
    %378 = vector.broadcast %cst_104 : f32 to vector<16x128xf32>
    %379 = arith.addf %378, %377 : vector<16x128xf32>
    %cst_105 = arith.constant 5.000000e-01 : f32
    %380 = vector.broadcast %cst_105 : f32 to vector<16x128xf32>
    %381 = arith.mulf %380, %379 : vector<16x128xf32>
    %382 = vector.extract_strided_slice %373 {offsets = [0, 128], sizes = [16, 128], strides = [1, 1]} : vector<16x512xf32> to vector<16x128xf32>
    %cst_106 = arith.constant 5.000000e-01 : f32
    %383 = vector.broadcast %cst_106 : f32 to vector<16x128xf32>
    %384 = arith.mulf %383, %382 : vector<16x128xf32>
    %385 = math.tanh %384 : vector<16x128xf32>
    %cst_107 = arith.constant 1.000000e+00 : f32
    %386 = vector.broadcast %cst_107 : f32 to vector<16x128xf32>
    %387 = arith.addf %386, %385 : vector<16x128xf32>
    %cst_108 = arith.constant 5.000000e-01 : f32
    %388 = vector.broadcast %cst_108 : f32 to vector<16x128xf32>
    %389 = arith.mulf %388, %387 : vector<16x128xf32>
    %390 = vector.extract_strided_slice %373 {offsets = [0, 256], sizes = [16, 128], strides = [1, 1]} : vector<16x512xf32> to vector<16x128xf32>
    %391 = math.tanh %390 : vector<16x128xf32>
    %392 = vector.extract_strided_slice %373 {offsets = [0, 384], sizes = [16, 128], strides = [1, 1]} : vector<16x512xf32> to vector<16x128xf32>
    %cst_109 = arith.constant 5.000000e-01 : f32
    %393 = vector.broadcast %cst_109 : f32 to vector<16x128xf32>
    %394 = arith.mulf %393, %392 : vector<16x128xf32>
    %395 = math.tanh %394 : vector<16x128xf32>
    %cst_110 = arith.constant 1.000000e+00 : f32
    %396 = vector.broadcast %cst_110 : f32 to vector<16x128xf32>
    %397 = arith.addf %396, %395 : vector<16x128xf32>
    %cst_111 = arith.constant 5.000000e-01 : f32
    %398 = vector.broadcast %cst_111 : f32 to vector<16x128xf32>
    %399 = arith.mulf %398, %397 : vector<16x128xf32>
    %400 = arith.mulf %389, %363 : vector<16x128xf32>
    %401 = arith.mulf %381, %391 : vector<16x128xf32>
    %402 = arith.addf %400, %401 : vector<16x128xf32>
    %403 = math.tanh %402 : vector<16x128xf32>
    %404 = arith.mulf %399, %403 : vector<16x128xf32>
    %405 = arith.addi %11, %c7_i32 : i32
    %406 = vector.broadcast %405 : i32 to vector<16x1xi32>
    %407 = arith.cmpi slt, %406, %10 : vector<16x1xi32>
    %408 = vector.shape_cast %407 : vector<16x1xi1> to vector<16x1xi1>
    %409 = vector.broadcast %408 : vector<16x1xi1> to vector<16x128xi1>
    %410 = arith.select %409, %404, %360 : vector<16x128xi1>, vector<16x128xf32>
    %411 = vector.shape_cast %407 : vector<16x1xi1> to vector<16x1xi1>
    %412 = vector.broadcast %411 : vector<16x1xi1> to vector<16x128xi1>
    %413 = arith.select %412, %402, %363 : vector<16x128xi1>, vector<16x128xf32>
    %c8_i32_112 = arith.constant 8 : i32
    %c0_113 = arith.constant 0 : index
    %c0_114 = arith.constant 0 : index
    %414 = vector.load %arg10[%c0_113, %c0_114] : memref<16x128xf32, #tpu.memory_space<vmem>>, vector<16x128xf32>
    tpu.vector_store %arg10[%c0_113, %c0_114], %410 {strides = array<i32>} : memref<16x128xf32, #tpu.memory_space<vmem>>, vector<16x128xf32>,
    %c0_115 = arith.constant 0 : index
    %c0_116 = arith.constant 0 : index
    %415 = vector.load %arg11[%c0_115, %c0_116] : memref<16x128xf32, #tpu.memory_space<vmem>>, vector<16x128xf32>
    tpu.vector_store %arg11[%c0_115, %c0_116], %413 {strides = array<i32>} : memref<16x128xf32, #tpu.memory_space<vmem>>, vector<16x128xf32>,
    %c0_i32_117 = arith.constant 0 : i32
    %416 = arith.cmpi eq, %arg0, %c0_i32_117 : i32
    %417 = arith.extui %416 : i1 to i32
    %c0_i32_118 = arith.constant 0 : i32
    %418 = arith.cmpi ne, %417, %c0_i32_118 : i32
    scf.if %418 {
      %419 = arith.truncf %410 : vector<16x128xf32> to vector<16x128xbf16>
      %c0_119 = arith.constant 0 : index
      %c0_120 = arith.constant 0 : index
      %420 = vector.load %arg6[%c0_119, %c0_120] : memref<128x8xbf16, #tpu.memory_space<vmem>>, vector<128x8xbf16>
      %cst_121 = arith.constant dense<0.000000e+00> : vector<16x8xf32>
      %421 = tpu.matmul %419, %420, %cst_121 {dimension_numbers = #tpu.dot_dimension_numbers<[1], [0], [0], [1], [0, 0, 1, 1], [], []>} : vector<16x128xbf16>, vector<128x8xbf16>, vector<16x8xf32> -> vector<16x8xf32>
      %c0_122 = arith.constant 0 : index
      %c0_123 = arith.constant 0 : index
      %422 = vector.load %arg7[%c0_122, %c0_123] : memref<1x8xf32, #tpu.memory_space<vmem>>, vector<1x8xf32>
      %423 = vector.broadcast %422 : vector<1x8xf32> to vector<16x8xf32>
      %424 = arith.addf %421, %423 : vector<16x8xf32>
      %c0_124 = arith.constant 0 : index
      %c0_125 = arith.constant 0 : index
      %425 = vector.load %arg8[%c0_124, %c0_125] : memref<16x8xf32, #tpu.memory_space<vmem>>, vector<16x8xf32>
      tpu.vector_store %arg8[%c0_124, %c0_125], %424 {strides = array<i32>} : memref<16x8xf32, #tpu.memory_space<vmem>>, vector<16x8xf32>,
    } else {
    }
    return
  }
  func.func @transform_0(%arg0: i32) -> (i32, i32) {
    %c0_i32 = arith.constant 0 : i32
    %c0_i32_0 = arith.constant 0 : i32
    return %arg0, %c0_i32 : i32, i32
  }
  func.func @transform_1(%arg0: i32) -> (i32, i32) {
    %c0_i32 = arith.constant 0 : i32
    %c0_i32_0 = arith.constant 0 : i32
    %c0_i32_1 = arith.constant 0 : i32
    return %c0_i32, %c0_i32_0 : i32, i32
  }
  func.func @transform_2(%arg0: i32) -> (i32, i32) {
    %c0_i32 = arith.constant 0 : i32
    %c0_i32_0 = arith.constant 0 : i32
    %c0_i32_1 = arith.constant 0 : i32
    return %c0_i32, %c0_i32_0 : i32, i32
  }
  func.func @transform_3(%arg0: i32) -> (i32, i32) {
    %c0_i32 = arith.constant 0 : i32
    %c0_i32_0 = arith.constant 0 : i32
    %c0_i32_1 = arith.constant 0 : i32
    return %c0_i32, %c0_i32_0 : i32, i32
  }
  func.func @transform_4(%arg0: i32) -> (i32, i32) {
    %c0_i32 = arith.constant 0 : i32
    %c0_i32_0 = arith.constant 0 : i32
    %c0_i32_1 = arith.constant 0 : i32
    return %c0_i32, %c0_i32_0 : i32, i32
  }
  func.func @transform_5(%arg0: i32) -> (i32, i32) {
    %c0_i32 = arith.constant 0 : i32
    %c0_i32_0 = arith.constant 0 : i32
    %c0_i32_1 = arith.constant 0 : i32
    return %c0_i32, %c0_i32_0 : i32, i32
  }
  func.func @transform_6(%arg0: i32) -> (i32, i32) {
    %c0_i32 = arith.constant 0 : i32
    %c0_i32_0 = arith.constant 0 : i32
    %c0_i32_1 = arith.constant 0 : i32
    return %c0_i32, %c0_i32_0 : i32, i32
  }
  func.func @transform_7(%arg0: i32) -> (i32, i32) {
    %c0_i32 = arith.constant 0 : i32
    %c0_i32_0 = arith.constant 0 : i32
    %c0_i32_1 = arith.constant 0 : i32
    return %c0_i32, %c0_i32_0 : i32, i32
  }
}

</mosaic_0001>

<bundles_post_ra>
// kernel: tpu_custom_call.1
= control target key start
LH: loop header
LB: loop body
LE: loop exit
PB: predicated region body
PF: predicated region fallthrough
CT: control target
= control target key end

     0   :  { %12 = vsyncpa [#allocation6], 0  ;;  %s2814_s24 = smov [#allocation5]   ;;  %s3776_s0 = inlined_call_operand.vmem [shape: bf16[128,16], index: 0, kind: input, shape index: {}]   ;;  %s3777_s1 = inlined_call_operand.vmem [shape: s32[16,1], index: 1, kind: input, shape index: {}]   ;;  %s3778_s2 = inlined_call_operand.vmem [shape: bf16[16,512], index: 2, kind: input, shape index: {}]   ;;  %s3779_s3 = inlined_call_operand.hbm [shape: bf16[128,512], index: 3, kind: input, shape index: {}]   ;;  %s3780_s4 = inlined_call_operand.vmem [shape: f32[1,512], index: 4, kind: input, shape index: {}]   ;;  %s3781_s5 = inlined_call_operand.vmem [shape: bf16[128,8], index: 5, kind: input, shape index: {}]   ;;  %s3782_s6 = inlined_call_operand.vmem [shape: f32[1,8], index: 6, kind: input, shape index: {}]   ;;  %s3783_s7 = inlined_call_operand.vmem [shape: f32[16,8], index: 7, kind: output, shape index: {}]  }
   0x1   :  { %s24_s25 = sshll.u32 %s2814_s24, 4  ;;  %s25_s25 = int_to_ptr.vmem [resolvable:$true] %s24_s25 }
   0x2   :  { %s2800_s26 = scalar_lea.vmem %s25_s25, 4096  ;;  %p2805_p1 = scmp.lt.s32.totalorder %s25_s25, %s25_s25 }
   0x3   :  { %p2801_p0 = scmp.ne.s32.totalorder %s25_s25, %s2800_s26  ;;  %p2806_p2 = scmp.lt.s32.totalorder %s2800_s26, %s2800_s26 }
   0x5   :  { %p2807_p3 = por %p2806_p2, %p2805_p1 }
   0x7   :  { %p2808_p4 = pnand %p2807_p3, %p2801_p0 }
   0x9   :  { %2811 = shalt.err (!%p2808_p4)
}
   0xa   :  { %s2815_s27 = smov 256   ;;  %s2816_s28 = smov 16  }
   0xb   :  { %30 = dma.hbm_to_vmem [thread:$0]  %s3779_s3, 4096, %s25_s25, [#allocation6], %s2815_s27, %s2815_s27, %s2816_s28  }
   0xc   :  { %2812 = dma.done.wait [#allocation6], 4096  }
   0xd   :  { %2813 = vsyncadd [#allocation6], 4294963200  ;;  %v3786_v0 = vmov 0   ;;  %v2530_v1 = vld [vmem:[%s3778_s2 + $0x4] ss:$16 sps:$4 sm:$0xff]   ;;  %vm129_vm0 = vcmask 130048  }
   0xe   :  { %186 = vmatprep.mubr.bf16.mxu0 %v3786_v0  ;;  %246 = vmatprep.mubr.bf16.mxu1 %v3786_v0  ;;  %v2532_v2 = vld [vmem:[%s3778_s2] ss:$16 sps:$4 sm:$0xff]   ;;  %v2535_v5 = vld [vmem:[%s3778_s2 + $0x8] ss:$16 sps:$4 sm:$0xff]   ;;  %v2537_v6 = vld [vmem:[%s3778_s2 + $0xc] ss:$16 sps:$4 sm:$0xff]  }
   0xf   :  { %2528 = vset.pattern.permute.xlu0 %v3786_v0  ;;  %2529 = vset.pattern.permute.xlu1 %v3786_v0  ;;  %v2533_v3 = vld [vmem:[%s3776_s0] sm:$0xff]   ;;  %v2880_v4 = vld [vmem:[%s3776_s0 + $0x30] sm:$0xff]   ;;  %v2538_v7 = vld [vmem:[%s3776_s0 + $0x8] sm:$0xff]   ;;  %v2818_v52 = vmov 0.0|0.0  }
  0x10   :  { %168 = vmatprep.subr.bf16.mxu0 %v2530_v1  ;;  %2519 = vmatprep.subr.bf16.mxu1 %v2530_v1  ;;  %v2896_v8 = vld [vmem:[#allocation5 + $0xe4] ss:$16 sps:$4 sm:$0xff]   ;;  %v2898_v9 = vld [vmem:[#allocation5 + $0xec] ss:$16 sps:$4 sm:$0xff]   ;;  %v2900_v10 = vld [vmem:[#allocation5 + $0xe0] ss:$16 sps:$4 sm:$0xff]  }
  0x11   :  { %169 = vmatpush1.bf16.msra.mxu0 %v2532_v2  ;;  %2520 = vmatpush1.bf16.msra.mxu1 %v2532_v2  ;;  %v2905_v11 = vld [vmem:[%s3776_s0 + $0x38] sm:$0xff]   ;;  %v2910_v12 = vld [vmem:[#allocation5 + $0xc4] ss:$16 sps:$4 sm:$0xff]   ;;  %v2912_v13 = vld [vmem:[#allocation5 + $0xc0] ss:$16 sps:$4 sm:$0xff]  }
  0x12   :  { %281 = vmatprep.subr.bf16.mxu1 %v2537_v6  ;;  %820 = vmatprep.subr.bf16.mxu0 %v2896_v8  ;;  %v2915_v14 = vld [vmem:[#allocation5 + $0xa4] ss:$16 sps:$4 sm:$0xff]   ;;  %v2923_v15 = vld [vmem:[#allocation5 + $0xa0] ss:$16 sps:$4 sm:$0xff]   ;;  %v2931_v18 = vld [vmem:[#allocation5 + $0xe8] ss:$16 sps:$4 sm:$0xff]  }
  0x13   :  { %v2926_v16 = vld [vmem:[#allocation5 + $0x84] ss:$16 sps:$4 sm:$0xff]   ;;  %v2933_v19 = vld [vmem:[#allocation5 + $0xcc] ss:$16 sps:$4 sm:$0xff]   ;;  %v2937_v20 = vld [vmem:[#allocation5 + $0x80] ss:$16 sps:$4 sm:$0xff]  }
  0x14   :  { %2347 = vmatmul.mubr.msk.bf16.vlgmr.msra.gmra.mxu0 %vm129_vm0, %v2533_v3  ;;  %2353 = vmatmul.mubr.msk.bf16.vlgmr.msra.gmra.mxu1 %vm129_vm0, %v2880_v4  ;;  %v2540_v17 = vld [vmem:[%s3776_s0 + $0x10] sm:$0xff]   ;;  %v2945_v22 = vld [vmem:[#allocation5 + $0xc8] ss:$16 sps:$4 sm:$0xff]   ;;  %v2949_v23 = vld [vmem:[#allocation5 + $0xac] ss:$16 sps:$4 sm:$0xff]  }
  0x15   :  { %196 = vmatprep.mubr.bf16.mxu0 %v3786_v0  ;;  %282 = vmatpush1.bf16.msra.mxu1 %v2535_v5  ;;  %v2941_v21 = vld [vmem:[#allocation5 + $0x64] ss:$16 sps:$4 sm:$0xff]   ;;  %v2952_v24 = vld [vmem:[#allocation5 + $0x60] ss:$16 sps:$4 sm:$0xff]   ;;  %v2550_v25 = vld [vmem:[%s3776_s0 + $0x18] sm:$0xff]  }
  0x16   :  { %256 = vmatprep.mubr.bf16.mxu1 %v3786_v0  ;;  %863 = vmatprep.subr.bf16.mxu1 %v2898_v9  ;;  %v2959_v26 = vld [vmem:[#allocation5 + $0xa8] ss:$16 sps:$4 sm:$0xff]   ;;  %v2961_v27 = vld [vmem:[#allocation5 + $0x44] ss:$16 sps:$4 sm:$0xff]   ;;  %v2964_v28 = vld [vmem:[#allocation5 + $0x40] ss:$16 sps:$4 sm:$0xff]  }
  0x17   :  { %821 = vmatpush1.bf16.msra.mxu0 %v2900_v10  ;;  %v2967_v29 = vld [vmem:[#allocation5 + $0x8c] ss:$16 sps:$4 sm:$0xff]   ;;  %v2971_v30 = vld [vmem:[#allocation5 + $0x24] ss:$16 sps:$4 sm:$0xff]   ;;  %v2975_v31 = vld [vmem:[#allocation5 + $0x20] ss:$16 sps:$4 sm:$0xff]  }
  0x18   :  { %822 = vmatprep.subr.bf16.mxu0 %v2910_v12  ;;  %v2977_v32 = vld [vmem:[#allocation5 + $0x88] ss:$16 sps:$4 sm:$0xff]   ;;  %v2984_v33 = vld [vmem:[%s3777_s1] sm:$0xff]  ;;  %v2993_v35 = vld [vmem:[#allocation5 + $0x6c] ss:$16 sps:$4 sm:$0xff]  }
  0x19   :  { %v2989_v34 = vld [vmem:[%s3777_s1 + $0x8] sm:$0xff]  ;;  %vm2427_vm1 = vcmp.gt.s32.totalorder %v2984_v33, 0  ;;  %v2560_v36 = vld [vmem:[%s3776_s0 + $0x20] sm:$0xff]   ;;  %vm2431_vm3 = vcmp.gt.s32.totalorder %v2984_v33, 2  ;;  %vm2433_vm4 = vcmp.gt.s32.totalorder %v2984_v33, 3  ;;  %vm2435_vm5 = vcmp.gt.s32.totalorder %v2984_v33, 4 }
  0x1a   :  { %vm2428_vm2 = vcmp.gt.s32.totalorder %v2989_v34, 0  ;;  %v3001_v37 = vld [vmem:[#allocation5 + $0x4] ss:$16 sps:$4 sm:$0xff]   ;;  %v982_v38 = vsel %vm2427_vm1, 1, %v3786_v0  ;;  %v3004_v39 = vld [vmem:[#allocation5] ss:$16 sps:$4 sm:$0xff]  }
  0x1b   :  { %823 = vmatpush1.bf16.msra.mxu0 %v2912_v13  ;;  %v3006_v40 = vld [vmem:[#allocation5 + $0x68] ss:$16 sps:$4 sm:$0xff]   ;;  %985 = vperm.xlu0 %2528, %v982_v38   ;;  %v3009_v41 = vld [vmem:[#allocation5 + $0x4c] ss:$16 sps:$4 sm:$0xff]   ;;  %v983_v42 = vsel %vm2428_vm2, 1, %v3786_v0  ;;  %v1326_v48 = vsel %vm2431_vm3, 1, %v3786_v0 }
  0x1c   :  { %2348 = vmatmul.mubr.msk.bf16.gmra.mxu0 %vm129_vm0, %v2538_v7  ;;  %2354 = vmatmul.mubr.msk.bf16.gmra.mxu1 %vm129_vm0, %v2905_v11  ;;  %v3020_v43 = vld [vmem:[#allocation5 + $0x48] ss:$16 sps:$4 sm:$0xff]   ;;  %v3024_v44 = vld [vmem:[#allocation5 + $0x2c] ss:$16 sps:$4 sm:$0xff]   ;;  %v1498_v50 = vsel %vm2433_vm4, 1, %v3786_v0  ;;  %v1670_v51 = vsel %vm2435_vm5, 1, %v3786_v0 }
  0x1d   :  { %206 = vmatprep.mubr.bf16.mxu0 %v3786_v0  ;;  %299 = vmatprep.mubr.bf16.mxu1 %v3786_v0  ;;  %v2570_v45 = vld [vmem:[%s3776_s0 + $0x28] sm:$0xff]   ;;  %vm2437_vm6 = vcmp.gt.s32.totalorder %v2984_v33, 5  ;;  %vm2439_vm7 = vcmp.gt.s32.totalorder %v2984_v33, 6  ;;  %vm2441_vm8 = vcmp.gt.s32.totalorder %v2984_v33, 7  ;;  %vm2429_vm9 = vcmp.gt.s32.totalorder %v2984_v33, 1 }
  0x1e   :  { %824 = vmatprep.subr.bf16.mxu0 %v2915_v14  ;;  %v3032_v46 = vld [vmem:[#allocation5 + $0x28] ss:$16 sps:$4 sm:$0xff]   ;;  %v3035_v47 = vld [vmem:[#allocation5 + $0xc] ss:$16 sps:$4 sm:$0xff]   ;;  %v1842_v53 = vsel %vm2437_vm6, 1, %v3786_v0  ;;  %v2014_v54 = vsel %vm2439_vm7, 1, %v3786_v0 }
  0x1f   :  { %825 = vmatpush1.bf16.msra.mxu0 %v2923_v15  ;;  %988 = vperm.xlu0 %2528, %v983_v42   ;;  %v3044_v49 = vld [vmem:[#allocation5 + $0x8] ss:$16 sps:$4 sm:$0xff]   ;;  %v2186_v55 = vsel %vm2441_vm8, 1, %v3786_v0  ;;  %vm2430_vm10 = vcmp.gt.s32.totalorder %v2989_v34, 1  ;;  %v1154_v56 = vsel %vm2429_vm9, 1, %v3786_v0  ;;  %vm2432_vm11 = vcmp.gt.s32.totalorder %v2989_v34, 2 }
  0x20   :  { %826 = vmatprep.subr.bf16.mxu0 %v2926_v16  ;;  %1157 = vperm.xlu1 %2529, %v1154_v56   ;;  %v1155_v59 = vsel %vm2430_vm10, 1, %v3786_v0  ;;  %v1327_v2 = vsel %vm2432_vm11, 1, %v3786_v0  ;;  %vm2434_vm12 = vcmp.gt.s32.totalorder %v2989_v34, 3  ;;  %vm2436_vm13 = vcmp.gt.s32.totalorder %v2989_v34, 4 }
  0x21   :  { %vm2438_vm14 = vcmp.gt.s32.totalorder %v2989_v34, 5  ;;  %vm2440_vm15 = vcmp.gt.s32.totalorder %v2989_v34, 6 }
  0x23   :  { %827 = vmatpush1.bf16.msra.mxu0 %v2937_v20  ;;  %1329 = vperm.xlu0 %2528, %v1326_v48  }
  0x24   :  { %2349 = vmatmul.mubr.msk.bf16.gmra.mxu0 %vm129_vm0, %v2540_v17  ;;  %2355 = vmatmul.mubr.msk.bf16.vlgmr.msra.gmra.mxu1 %vm129_vm0, %v2533_v3 }
  0x25   :  { %864 = vmatpush1.bf16.msra.mxu1 %v2931_v18  ;;  %216 = vmatprep.mubr.bf16.mxu0 %v3786_v0 }
  0x26   :  { %309 = vmatprep.mubr.bf16.mxu1 %v3786_v0  ;;  %865 = vmatprep.subr.bf16.mxu1 %v2933_v19 }
  0x27   :  { %828 = vmatprep.subr.bf16.mxu0 %v2941_v21  ;;  %1501 = vperm.xlu0 %2528, %v1498_v50  }
  0x28   :  { %829 = vmatpush1.bf16.msra.mxu0 %v2952_v24  ;;  %1160 = vperm.xlu1 %2529, %v1155_v59  }
  0x29   :  { %866 = vmatpush1.bf16.msra.mxu1 %v2945_v22  ;;  %830 = vmatprep.subr.bf16.mxu0 %v2961_v27 }
  0x2a   :  { %867 = vmatprep.subr.bf16.mxu1 %v2949_v23 }
  0x2b   :  { %1673 = vperm.xlu0 %2528, %v1670_v51  }
  0x2c   :  { %2350 = vmatmul.mubr.msk.bf16.gmra.mxu0 %vm129_vm0, %v2550_v25  ;;  %2356 = vmatmul.mubr.msk.bf16.gmra.mxu1 %vm129_vm0, %v2538_v7 }
  0x2d   :  { %226 = vmatprep.mubr.bf16.mxu0 %v3786_v0  ;;  %319 = vmatprep.mubr.bf16.mxu1 %v3786_v0 }
  0x2e   :  { %868 = vmatpush1.bf16.msra.mxu1 %v2959_v26  ;;  %831 = vmatpush1.bf16.msra.mxu0 %v2964_v28 }
  0x2f   :  { %869 = vmatprep.subr.bf16.mxu1 %v2967_v29  ;;  %832 = vmatprep.subr.bf16.mxu0 %v2971_v30 }
  0x30   :  { %1845 = vperm.xlu0 %2528, %v1842_v53   ;;  %1332 = vperm.xlu1 %2529, %v1327_v2   ;;  %v2015_v2 = vsel %vm2440_vm15, 1, %v3786_v0 }
  0x32   :  { %870 = vmatpush1.bf16.msra.mxu1 %v2977_v32  ;;  %833 = vmatpush1.bf16.msra.mxu0 %v2975_v31 }
  0x33   :  { %871 = vmatprep.subr.bf16.mxu1 %v2993_v35  ;;  %834 = vmatprep.subr.bf16.mxu0 %v3001_v37 }
  0x34   :  { %2351 = vmatmul.mubr.msk.bf16.gmra.mxu0 %vm129_vm0, %v2560_v36  ;;  %2357 = vmatmul.mubr.msk.bf16.gmra.mxu1 %vm129_vm0, %v2540_v17 }
  0x35   :  { %236 = vmatprep.mubr.bf16.mxu0 %v3786_v0  ;;  %329 = vmatprep.mubr.bf16.mxu1 %v3786_v0 }
  0x36   :  { %872 = vmatpush1.bf16.msra.mxu1 %v3006_v40  ;;  %835 = vmatpush1.bf16.msra.mxu0 %v3004_v39 }
  0x37   :  { %873 = vmatprep.subr.bf16.mxu1 %v3009_v41  ;;  %1012 = vmatprep.subr.bf16.mxu0 %v2896_v8 }
  0x38   :  { %2017 = vperm.xlu0 %2528, %v2014_v54  }
  0x3a   :  { %874 = vmatpush1.bf16.msra.mxu1 %v3020_v43 }
  0x3b   :  { %875 = vmatprep.subr.bf16.mxu1 %v3024_v44 }
  0x3c   :  { %2352 = vmatmul.mubr.msk.bf16.gmra.mxu0 %vm129_vm0, %v2570_v45  ;;  %2358 = vmatmul.mubr.msk.bf16.gmra.mxu1 %vm129_vm0, %v2550_v25 }
  0x3d   :  { %339 = vmatprep.mubr.bf16.mxu1 %v3786_v0  ;;  %852 = vmatprep.mubr.bf16.mxu0 %v3786_v0 }
  0x3e   :  { %876 = vmatpush1.bf16.msra.mxu1 %v3032_v46  ;;  %2189 = vperm.xlu0 %2528, %v2186_v55   ;;  %v1843_v55 = vsel %vm2438_vm14, 1, %v3786_v0 }
  0x3f   :  { %877 = vmatprep.subr.bf16.mxu1 %v3035_v47 }
  0x42   :  { %878 = vmatpush1.bf16.msra.mxu1 %v3044_v49 }
  0x43   :  { %1055 = vmatprep.subr.bf16.mxu1 %v2898_v9 }
  0x44   :  { %2359 = vmatmul.mubr.msk.bf16.gmra.mxu1 %vm129_vm0, %v2560_v36  ;;  %853 = vmatmul.mubr.bf16.vlgmr.msra.gmra.mxu0 %v2818_v52 }
  0x45   :  { %349 = vmatprep.mubr.bf16.mxu1 %v3786_v0  ;;  %1013 = vmatpush1.bf16.msra.mxu0 %v2900_v10 }
  0x46   :  { %1014 = vmatprep.subr.bf16.mxu0 %v2910_v12  ;;  %1044 = vmatprep.mubr.bf16.mxu0 %v3786_v0 }
  0x49   :  { %1015 = vmatpush1.bf16.msra.mxu0 %v2912_v13 }
  0x4a   :  { %1016 = vmatprep.subr.bf16.mxu0 %v2915_v14 }
  0x4c   :  { %2360 = vmatmul.mubr.msk.bf16.gmra.mxu1 %vm129_vm0, %v2570_v45  ;;  %v1671_v45 = vsel %vm2436_vm13, 1, %v3786_v0 }
  0x4d   :  { %359 = vmatprep.mubr.bf16.mxu1 %v3786_v0  ;;  %1017 = vmatpush1.bf16.msra.mxu0 %v2923_v15 }
  0x4e   :  { %1018 = vmatprep.subr.bf16.mxu0 %v2926_v16 }
  0x51   :  { %1019 = vmatpush1.bf16.msra.mxu0 %v2937_v20 }
  0x52   :  { %1020 = vmatprep.subr.bf16.mxu0 %v2941_v21 }
  0x54   :  { %2361 = vmatmul.mubr.msk.bf16.gmra.mxu1 %vm129_vm0, %v2880_v4 }
  0x55   :  { %369 = vmatprep.mubr.bf16.mxu1 %v3786_v0  ;;  %1021 = vmatpush1.bf16.msra.mxu0 %v2952_v24 }
  0x56   :  { %1022 = vmatprep.subr.bf16.mxu0 %v2961_v27 }
  0x59   :  { %1023 = vmatpush1.bf16.msra.mxu0 %v2964_v28 }
  0x5a   :  { %1024 = vmatprep.subr.bf16.mxu0 %v2971_v30 }
  0x5c   :  { %2362 = vmatmul.mubr.msk.bf16.gmra.mxu1 %vm129_vm0, %v2905_v11  ;;  %v1499_v11 = vsel %vm2434_vm12, 1, %v3786_v0  ;;  %vm2442_vm0 = vcmp.gt.s32.totalorder %v2989_v34, 7 }
  0x5d   :  { %895 = vmatprep.mubr.bf16.mxu1 %v3786_v0  ;;  %1025 = vmatpush1.bf16.msra.mxu0 %v2975_v31 }
  0x5e   :  { %1026 = vmatprep.subr.bf16.mxu0 %v3001_v37  ;;  %1504 = vperm.xlu1 %2529, %v1499_v11  }
  0x61   :  { %1027 = vmatpush1.bf16.msra.mxu0 %v3004_v39 }
  0x62   :  { %1184 = vmatprep.subr.bf16.mxu0 %v2896_v8  ;;  %1676 = vperm.xlu1 %2529, %v1671_v45  }
  0x64   :  { %896 = vmatmul.mubr.bf16.vlgmr.msra.gmra.mxu1 %v2818_v52 }
  0x65   :  { %1056 = vmatpush1.bf16.msra.mxu1 %v2931_v18  ;;  %1087 = vmatprep.mubr.bf16.mxu1 %v3786_v0 }
  0x66   :  { %1057 = vmatprep.subr.bf16.mxu1 %v2933_v19  ;;  %1848 = vperm.xlu1 %2529, %v1843_v55  }
  0x69   :  { %1058 = vmatpush1.bf16.msra.mxu1 %v2945_v22 }
  0x6a   :  { %1059 = vmatprep.subr.bf16.mxu1 %v2949_v23  ;;  %2020 = vperm.xlu1 %2529, %v2015_v2  }
  0x6d   :  { %1060 = vmatpush1.bf16.msra.mxu1 %v2959_v26 }
  0x6e   :  { %1061 = vmatprep.subr.bf16.mxu1 %v2967_v29 }
  0x71   :  { %1062 = vmatpush1.bf16.msra.mxu1 %v2977_v32 }
  0x72   :  { %1063 = vmatprep.subr.bf16.mxu1 %v2993_v35 }
  0x75   :  { %1064 = vmatpush1.bf16.msra.mxu1 %v3006_v40 }
  0x76   :  { %1065 = vmatprep.subr.bf16.mxu1 %v3009_v41 }
  0x79   :  { %1066 = vmatpush1.bf16.msra.mxu1 %v3020_v43 }
  0x7a   :  { %1067 = vmatprep.subr.bf16.mxu1 %v3024_v44 }
  0x7d   :  { %1068 = vmatpush1.bf16.msra.mxu1 %v3032_v46 }
  0x7e   :  { %1069 = vmatprep.subr.bf16.mxu1 %v3035_v47 }
  0x81   :  { %1070 = vmatpush1.bf16.msra.mxu1 %v3044_v49 }
  0x82   :  { %1227 = vmatprep.subr.bf16.mxu1 %v2898_v9 }
  0xd4   :  { %v3105_v57 = vpop.f32.mrf.mxu0  ;;  %v248_v58 = vpop.f32.mrf.mxu1 }
  0xd6   :  { %v3108_v60 = vpop.f32.mrf.mxu0  ;;  %v250_v61 = vpop.f32.mrf.mxu1 }
  0xd7   :  { %v3111_v62 = vpack.c.bf16 %v250_v61, %v248_v58 }
  0xd8   :  { %v3113_v63 = vpop.f32.mrf.mxu0  ;;  %v252_v1 = vpop.f32.mrf.mxu1 }
  0xd9   :  { %3813 = vst [vmem:[#allocation8_spill] sm:$0xff] %v3111_v62 }
  0xda   :  { %v3116_v3 = vpop.f32.mrf.mxu0  ;;  %v254_v4 = vpop.f32.mrf.mxu1 }
  0xdb   :  { %v3119_v5 = vpack.c.bf16 %v254_v4, %v252_v1 }
  0xdc   :  { %v198_v6 = vpop.f32.mrf.mxu0  ;;  %v258_v7 = vpop.f32.mrf.mxu1 }
  0xdd   :  { %3814 = vst [vmem:[#allocation9_spill] sm:$0xff] %v3119_v5 }
  0xde   :  { %v200_v17 = vpop.f32.mrf.mxu0  ;;  %v260_v25 = vpop.f32.mrf.mxu1 }
  0xdf   :  { %v3123_v33 = vpack.c.bf16 %v200_v17, %v198_v6  ;;  %v3125_v36 = vpack.c.bf16 %v260_v25, %v258_v7  ;;  %v2187_v25 = vsel %vm2442_vm0, 1, %v3786_v0  ;;  %vm2820_vm0 = vmmov 0  }
  0xe0   :  { %v202_v38 = vpop.f32.mrf.mxu0  ;;  %v262_v42 = vpop.f32.mrf.mxu1  ;;  %2192 = vperm.xlu1 %2529, %v2187_v25  }
  0xe1   :  { %3815 = vst [vmem:[#allocation10_spill] sm:$0xff] %v3125_v36 }
  0xe2   :  { %v204_v48 = vpop.f32.mrf.mxu0  ;;  %v264_v50 = vpop.f32.mrf.mxu1 }
  0xe3   :  { %v3129_v51 = vpack.c.bf16 %v204_v48, %v202_v38  ;;  %v3131_v52 = vpack.c.bf16 %v264_v50, %v262_v42 }
  0xe4   :  { %v208_v53 = vpop.f32.mrf.mxu0  ;;  %v3133_v54 = vpop.f32.mrf.mxu1 }
  0xe5   :  { %3816 = vst [vmem:[#allocation11_spill] sm:$0xff] %v3129_v51  ;;  %3817 = vst [vmem:[#allocation12_spill] sm:$0xff] %v3131_v52 }
  0xe6   :  { %v210_v56 = vpop.f32.mrf.mxu0  ;;  %v3136_v58 = vpop.f32.mrf.mxu1 }
  0xe7   :  { %v3139_v59 = vpack.c.bf16 %v210_v56, %v208_v53 }
  0xe8   :  { %v212_v61 = vpop.f32.mrf.mxu0  ;;  %v3141_v1 = vpop.f32.mrf.mxu1 }
  0xe9   :  { %3818 = vst [vmem:[#allocation13_spill] sm:$0xff] %v3139_v59 }
  0xea   :  { %v214_v4 = vpop.f32.mrf.mxu0  ;;  %v3144_v6 = vpop.f32.mrf.mxu1 }
  0xeb   :  { %v3147_v7 = vpack.c.bf16 %v214_v4, %v212_v61 }
  0xec   :  { %v218_v11 = vpop.f32.mrf.mxu0  ;;  %v311_v17 = vpop.f32.mrf.mxu1 }
  0xed   :  { %3819 = vst [vmem:[#allocation14_spill] sm:$0xff] %v3147_v7 }
  0xee   :  { %v220_v38 = vpop.f32.mrf.mxu0  ;;  %v313_v42 = vpop.f32.mrf.mxu1 }
  0xef   :  { %v3150_v45 = vpack.c.bf16 %v220_v38, %v218_v11  ;;  %v3152_v48 = vpack.c.bf16 %v313_v42, %v311_v17 }
  0xf0   :  { %v222_v50 = vpop.f32.mrf.mxu0  ;;  %v315_v53 = vpop.f32.mrf.mxu1 }
  0xf1   :  { %3820 = vst [vmem:[#allocation15_spill] sm:$0xff] %v3150_v45  ;;  %3821 = vst [vmem:[#allocation16_spill] sm:$0xff] %v3152_v48 }
  0xf2   :  { %v224_v55 = vpop.f32.mrf.mxu0  ;;  %v317_v56 = vpop.f32.mrf.mxu1 }
  0xf3   :  { %v3154_v52 = vpack.c.bf16 %v224_v55, %v222_v50  ;;  %v3156_v34 = vpack.c.bf16 %v317_v56, %v315_v53 }
  0xf4   :  { %v228_v61 = vpop.f32.mrf.mxu0  ;;  %v321_v4 = vpop.f32.mrf.mxu1 }
  0xf5   :  { %3822 = vst [vmem:[#allocation17_spill] sm:$0xff] %v3154_v52  ;;  %3823 = vst [vmem:[#allocation18_spill] sm:$0xff] %v3156_v34 }
  0xf6   :  { %v230_v2 = vpop.f32.mrf.mxu0  ;;  %v323_v36 = vpop.f32.mrf.mxu1 }
  0xf7   :  { %v3158_v0 = vpack.c.bf16 %v230_v2, %v228_v61  ;;  %v3160_v5 = vpack.c.bf16 %v323_v36, %v321_v4 }
  0xf8   :  { %v232_v11 = vpop.f32.mrf.mxu0  ;;  %v325_v17 = vpop.f32.mrf.mxu1 }
  0xf9   :  { %3824 = vst [vmem:[#allocation19_spill] sm:$0xff] %v3158_v0  ;;  %3825 = vst [vmem:[#allocation20_spill] sm:$0xff] %v3160_v5 }
  0xfa   :  { %v234_v38 = vpop.f32.mrf.mxu0  ;;  %v327_v42 = vpop.f32.mrf.mxu1 }
  0xfb   :  { %v3162_v62 = vpack.c.bf16 %v234_v38, %v232_v11  ;;  %v3164_v25 = vpack.c.bf16 %v327_v42, %v325_v17 }
  0xfc   :  { %v238_v50 = vpop.f32.mrf.mxu0  ;;  %v331_v55 = vpop.f32.mrf.mxu1 }
  0xfd   :  { %3826 = vst [vmem:[#allocation21_spill] sm:$0xff] %v3162_v62  ;;  %3827 = vst [vmem:[#allocation22_spill] sm:$0xff] %v3164_v25  ;;  %v915_v25 = vlaneseq }
  0xfe   :  { %v240_v53 = vpop.f32.mrf.mxu0  ;;  %v333_v56 = vpop.f32.mrf.mxu1 }
  0xff   :  { %v3166_v52 = vpack.c.bf16 %v240_v53, %v238_v50  ;;  %v3168_v45 = vpack.c.bf16 %v333_v56, %v331_v55  ;;  %v3178_v53 = vshrl.u32 %v915_v25, 7  ;;  %v636_v25 = vld [vmem:[%s3780_s4] sm:$0xf] }
 0x100   :  { %v242_v61 = vpop.f32.mrf.mxu0  ;;  %v335_v2 = vpop.f32.mrf.mxu1 }
 0x101   :  { %3828 = vst [vmem:[#allocation23_spill] sm:$0xff] %v3166_v52  ;;  %3829 = vst [vmem:[#allocation24_spill] sm:$0xff] %v3168_v45 }
 0x102   :  { %v244_v36 = vpop.f32.mrf.mxu0  ;;  %v337_v4 = vpop.f32.mrf.mxu1 }
 0x103   :  { %v3170_v0 = vpack.c.bf16 %v244_v36, %v242_v61  ;;  %v3172_v7 = vpack.c.bf16 %v337_v4, %v335_v2  ;;  %v2452_v61 = vpack.c.bf16 %v3108_v60, %v3105_v57  ;;  %v921_v4 = vsub.s32 1, %v3178_v53 }
 0x104   :  { %v341_v11 = vpop.f32.mrf.mxu1  ;;  %v854_v62 = vpop.f32.mrf.mxu0 }
 0x105   :  { %3830 = vst [vmem:[#allocation25_spill] sm:$0xff] %v3170_v0  ;;  %3831 = vst [vmem:[#allocation26_spill] sm:$0xff] %v3172_v7 }
 0x106   :  { %v343_v38 = vpop.f32.mrf.mxu1  ;;  %v856_v56 = vpop.f32.mrf.mxu0 }
 0x107   :  { %v3174_v17 = vpack.c.bf16 %v343_v38, %v341_v11  ;;  %v917_v38 = vsub.s32 0, %v3178_v53 }
 0x108   :  { %v345_v42 = vpop.f32.mrf.mxu1  ;;  %v858_v0 = vpop.f32.mrf.mxu0 }
 0x109   :  { %3832 = vst [vmem:[#allocation27_spill] sm:$0xff] %v3174_v17  ;;  %v3195_v17 = vrot.slane %v636_v25, %v917_v38 }
 0x10a   :  { %v347_v5 = vpop.f32.mrf.mxu1  ;;  %v860_v7 = vpop.f32.mrf.mxu0 }
 0x10b   :  { %v3176_v50 = vpack.c.bf16 %v347_v5, %v345_v42  ;;  %v2454_v5 = vpack.c.bf16 %v3116_v3, %v3113_v63  ;;  %v652_v42 = vunpack.c.h.bf16 %v2452_v61 }
 0x10c   :  { %v351_v55 = vpop.f32.mrf.mxu1 }
 0x10d   :  { %3833 = vst [vmem:[#allocation28_spill] sm:$0xff] %v3176_v50  ;;  %v651_v50 = vunpack.c.l.bf16 %v2452_v61  ;;  %v907_v60 = vadd.f32 %v856_v56, %v652_v42  ;;  %v656_v45 = vunpack.c.h.bf16 %v2454_v5  ;;  %v655_v34 = vunpack.c.l.bf16 %v2454_v5 }
 0x10e   :  { %v353_v36 = vpop.f32.mrf.mxu1 }
 0x10f   :  { %v3182_v2 = vpack.c.bf16 %v353_v36, %v351_v55  ;;  %v3193_v55 = vrot.slane %v636_v25, %v921_v4  ;;  %v911_v51 = vadd.f32 %v860_v7, %v656_v45  ;;  %v910_v61 = vadd.f32 %v858_v0, %v655_v34 }
 0x110   :  { %v355_v11 = vpop.f32.mrf.mxu1  ;;  %v925_v7 = vsub.s32 2, %v3178_v53 }
 0x111   :  { %3834 = vst [vmem:[#allocation29_spill] sm:$0xff] %v3182_v2  ;;  %v906_v2 = vadd.f32 %v854_v62, %v651_v50  ;;  %v936_v3 = vadd.f32 %v3193_v55, %v907_v60  ;;  %v940_v62 = vadd.f32 %v3193_v55, %v911_v51  ;;  %v939_v42 = vadd.f32 %v3195_v17, %v910_v61 }
 0x112   :  { %v357_v52 = vpop.f32.mrf.mxu1  ;;  %v2453_v60 = vpack.c.bf16 %v3136_v58, %v3133_v54  ;;  %v2455_v51 = vpack.c.bf16 %v3144_v6, %v3141_v1 }
 0x113   :  { %v3191_v57 = vpack.c.bf16 %v357_v52, %v355_v11  ;;  %v935_v52 = vadd.f32 %v3195_v17, %v906_v2  ;;  %v951_v11 = vmul.f32 0.5, %v936_v3  ;;  %v952_v0 = vmul.f32 0.5, %v940_v62 }
 0x114   :  { %v361_v36 = vpop.f32.mrf.mxu1  ;;  %v3214_v3 = vrot.slane %v636_v25, %v925_v7  ;;  %v658_v1 = vunpack.c.h.bf16 %v2455_v51 }
 0x115   :  { %3835 = vst [vmem:[#allocation30_spill] sm:$0xff] %v3191_v57  ;;  %v943_v38 = vmul.f32 0.5, %v935_v52  ;;  %2600 = vtanh.f32 %v951_v11  ;;  %v657_v11 = vunpack.c.l.bf16 %v2455_v51 }
 0x116   :  { %v363_v59 = vpop.f32.mrf.mxu1 }
 0x117   :  { %v3197_v63 = vpack.c.bf16 %v363_v59, %v361_v36  ;;  %2602 = vtanh.f32 %v943_v38  ;;  %v653_v36 = vunpack.c.l.bf16 %v2453_v60 }
 0x118   :  { %v365_v48 = vpop.f32.mrf.mxu1  ;;  %2604 = vtanh.f32 %v952_v0 }
 0x119   :  { %3836 = vst [vmem:[#allocation31_spill] sm:$0xff] %v3197_v63 }
 0x11a   :  { %v367_v56 = vpop.f32.mrf.mxu1 }
 0x11b   :  { %v3201_v4 = vpack.c.bf16 %v367_v56, %v365_v48  ;;  %v944_v48 = vmul.f32 0.5, %v939_v42  ;;  %v929_v56 = vsub.s32 3, %v3178_v53 }
 0x11c   :  { %v371_v50 = vpop.f32.mrf.mxu1 }
 0x11d   :  { %3837 = vst [vmem:[#allocation32_spill] sm:$0xff] %v3201_v4  ;;  %2606 = vtanh.f32 %v944_v48 }
 0x11e   :  { %v373_v59 = vpop.f32.mrf.mxu1 }
 0x11f   :  { %v3207_v5 = vpack.c.bf16 %v373_v59, %v371_v50  ;;  %v654_v50 = vunpack.c.h.bf16 %v2453_v60  ;;  %v3218_v59 = vrot.slane %v636_v25, %v929_v56 }
 0x120   :  { %v375_v45 = vpop.f32.mrf.mxu1 }
 0x121   :  { %3838 = vst [vmem:[#allocation33_spill] sm:$0xff] %v3207_v5 }
 0x122   :  { %v377_v34 = vpop.f32.mrf.mxu1 }
 0x123   :  { %v3212_v2 = vpack.c.bf16 %v377_v34, %v375_v45  ;;  %v2601_v45 = vpop.eup %2600 }
 0x124   :  { %v897_v54 = vpop.f32.mrf.mxu1  ;;  %v2603_v48 = vpop.eup %2602 }
 0x125   :  { %3839 = vst [vmem:[#allocation34_spill] sm:$0xff] %v3212_v2  ;;  %v908_v58 = vadd.f32 %v897_v54, %v653_v36  ;;  %v955_v36 = vadd.f32 1.0, %v2601_v45  ;;  %v2605_v54 = vpop.eup %2604 }
 0x126   :  { %v899_v52 = vpop.f32.mrf.mxu1  ;;  %v956_v51 = vadd.f32 1.0, %v2605_v54 }
 0x127   :  { %v937_v61 = vadd.f32 %v3214_v3, %v908_v58  ;;  %v909_v42 = vadd.f32 %v899_v52, %v654_v50  ;;  %v947_v58 = vadd.f32 1.0, %v2603_v48  ;;  %v957_v52 = vmul.f32 0.5, %v955_v36 }
 0x128   :  { %v901_v62 = vpop.f32.mrf.mxu1 }
 0x129   :  { %2608 = vtanh.f32 %v937_v61  ;;  %v912_v38 = vadd.f32 %v901_v62, %v657_v11  ;;  %v938_v34 = vadd.f32 %v3218_v59, %v909_v42  ;;  %v949_v25 = vmul.f32 0.5, %v947_v58  ;;  %v3229_v58 = vpop.permute.xlu0 %985 }
 0x12a   :  { %v903_v6 = vpop.f32.mrf.mxu1  ;;  %v2607_v60 = vpop.eup %2606  ;;  %vm990_vm1 = vcmp.eq.s32.totalorder %v3229_v58, 1  ;;  %v3321_v58 = vld [vmem:[#allocation5 + $0xe0] ss:$16 sps:$4 sm:$0xff]  }
 0x12b   :  { %v941_v7 = vadd.f32 %v3214_v3, %v912_v38  ;;  %v913_v0 = vadd.f32 %v903_v6, %v658_v1  ;;  %v961_v61 = vmul.f32 0.5, %v938_v34  ;;  %v948_v62 = vadd.f32 1.0, %v2607_v60 }
 0x12c   :  { %v969_v38 = vmul.f32 0.0, %v957_v52  ;;  %v958_v1 = vmul.f32 0.5, %v956_v51 }
 0x12d   :  { %2610 = vtanh.f32 %v941_v7  ;;  %v942_v53 = vadd.f32 %v3218_v59, %v913_v0  ;;  %v950_v6 = vmul.f32 0.5, %v948_v62 }
 0x12e   :  { %2612 = vtanh.f32 %v961_v61  ;;  %v970_v0 = vmul.f32 0.0, %v958_v1 }
 0x12f   :  { %v962_v11 = vmul.f32 0.5, %v942_v53 }
 0x131   :  { %2614 = vtanh.f32 %v962_v11 }
 0x136   :  { %v2609_v56 = vpop.eup %2608 }
 0x137   :  { %v971_v50 = vmul.f32 %v2609_v56, %v949_v25  ;;  %v3235_v56 = vpop.permute.xlu0 %988 }
 0x138   :  { %vm991_vm2 = vcmp.eq.s32.totalorder %v3235_v56, 1  ;;  %v3335_v56 = vld [vmem:[#allocation5 + $0xc0] ss:$16 sps:$4 sm:$0xff]  }
 0x139   :  { %v3223_v42 = vadd.f32 %v971_v50, %v969_v38  ;;  %vm2484_vm3 = vmpackc.low %vm991_vm2, %vm990_vm1  ;;  %v3840_v50 = vmov 0   ;;  %v3842_v38 = vld [vmem:[#allocation11_spill] sm:$0xff] }
 0x13a   :  { %v2611_v7 = vpop.eup %2610  ;;  %v1007_v1 = vunpack.c.l.bf16 %v3842_v38 }
 0x13b   :  { %v972_v45 = vmul.f32 %v2611_v7, %v950_v6  ;;  %2616 = vtanh.f32 %v3223_v42  ;;  %v2613_v34 = vpop.eup %2612 }
 0x13c   :  { %v965_v53 = vadd.f32 1.0, %v2613_v34  ;;  %v3843_v34 = vld [vmem:[#allocation18_spill] sm:$0xff] }
 0x13d   :  { %v3226_v48 = vadd.f32 %v972_v45, %v970_v0  ;;  %v1008_v0 = vunpack.c.h.bf16 %v3842_v38 }
 0x13e   :  { %v2615_v36 = vpop.eup %2614  ;;  %v967_v61 = vmul.f32 0.5, %v965_v53 }
 0x13f   :  { %2618 = vtanh.f32 %v3226_v48  ;;  %v966_v54 = vadd.f32 1.0, %v2615_v36  ;;  %v1009_v36 = vunpack.c.l.bf16 %v3843_v34 }
 0x141   :  { %v968_v51 = vmul.f32 0.5, %v966_v54 }
 0x148   :  { %v2617_v60 = vpop.eup %2616 }
 0x149   :  { %v3231_v52 = vmul.f32 %v2617_v60, %v967_v61 }
 0x14c   :  { %v2619_v11 = vpop.eup %2618 }
 0x14d   :  { %v3233_v25 = vmul.f32 %v2619_v11, %v968_v51 }
 0x14f   :  { %v2485_v62 = vpack.c.bf16 %v3233_v25, %v3231_v52 }
 0x151   :  { %2486 = vmatmul.mubr.msk.bf16.vlgmr.msra.gmra.mxu0 %vm2484_vm3, %v2485_v62  ;;  %2489 = vmatmul.mubr.msk.bf16.vlgmr.msra.gmra.mxu1 %vm2484_vm3, %v2485_v62  ;;  %vm2320_vm3 = vcmask 64512  }
 0x152   :  { %1185 = vmatpush1.bf16.msra.mxu0 %v2900_v10  ;;  %1228 = vmatpush1.bf16.msra.mxu1 %v2931_v18  ;;  %v1003_v10 = vunpack.c.l.bf16 %v3123_v33  ;;  %v1004_v18 = vunpack.c.h.bf16 %v3123_v33 }
 0x153   :  { %1186 = vmatprep.subr.bf16.mxu0 %v2910_v12  ;;  %1229 = vmatprep.subr.bf16.mxu1 %v2933_v19 }
 0x154   :  { %1216 = vmatprep.mubr.bf16.mxu0 %v3840_v50  ;;  %1259 = vmatprep.mubr.bf16.mxu1 %v3840_v50 }
 0x156   :  { %1187 = vmatpush1.bf16.msra.mxu0 %v2912_v13  ;;  %1230 = vmatpush1.bf16.msra.mxu1 %v2945_v22 }
 0x157   :  { %1188 = vmatprep.subr.bf16.mxu0 %v2915_v14  ;;  %1231 = vmatprep.subr.bf16.mxu1 %v2949_v23 }
 0x15a   :  { %1189 = vmatpush1.bf16.msra.mxu0 %v2923_v15  ;;  %1232 = vmatpush1.bf16.msra.mxu1 %v2959_v26  ;;  %v3841_v15 = vld [vmem:[#allocation16_spill] sm:$0xff] }
 0x15b   :  { %1190 = vmatprep.subr.bf16.mxu0 %v2926_v16  ;;  %1233 = vmatprep.subr.bf16.mxu1 %v2967_v29  ;;  %v1005_v16 = vunpack.c.l.bf16 %v3841_v15  ;;  %v1006_v11 = vunpack.c.h.bf16 %v3841_v15 }
 0x15e   :  { %1191 = vmatpush1.bf16.msra.mxu0 %v2937_v20  ;;  %1234 = vmatpush1.bf16.msra.mxu1 %v2977_v32 }
 0x15f   :  { %1192 = vmatprep.subr.bf16.mxu0 %v2941_v21  ;;  %1235 = vmatprep.subr.bf16.mxu1 %v2993_v35 }
 0x162   :  { %1193 = vmatpush1.bf16.msra.mxu0 %v2952_v24  ;;  %1236 = vmatpush1.bf16.msra.mxu1 %v3006_v40 }
 0x163   :  { %1194 = vmatprep.subr.bf16.mxu0 %v2961_v27  ;;  %1237 = vmatprep.subr.bf16.mxu1 %v3009_v41 }
 0x166   :  { %1195 = vmatpush1.bf16.msra.mxu0 %v2964_v28  ;;  %1238 = vmatpush1.bf16.msra.mxu1 %v3020_v43 }
 0x167   :  { %1196 = vmatprep.subr.bf16.mxu0 %v2971_v30  ;;  %1239 = vmatprep.subr.bf16.mxu1 %v3024_v44 }
 0x16a   :  { %1197 = vmatpush1.bf16.msra.mxu0 %v2975_v31  ;;  %1240 = vmatpush1.bf16.msra.mxu1 %v3032_v46 }
 0x16b   :  { %1198 = vmatprep.subr.bf16.mxu0 %v3001_v37  ;;  %1241 = vmatprep.subr.bf16.mxu1 %v3035_v47 }
 0x16e   :  { %1199 = vmatpush1.bf16.msra.mxu0 %v3004_v39  ;;  %1242 = vmatpush1.bf16.msra.mxu1 %v3044_v49 }
 0x16f   :  { %1356 = vmatprep.subr.bf16.mxu0 %v2896_v8  ;;  %1399 = vmatprep.subr.bf16.mxu1 %v2898_v9 }
 0x211   :  { %v1046_v12 = vpop.f32.mrf.mxu0  ;;  %v1089_v13 = vpop.f32.mrf.mxu1 }
 0x212   :  { %v1098_v14 = vadd.f32 %v1046_v12, %v1003_v10  ;;  %v1100_v22 = vadd.f32 %v1089_v13, %v1005_v16 }
 0x213   :  { %v1048_v19 = vpop.f32.mrf.mxu0  ;;  %v1091_v20 = vpop.f32.mrf.mxu1 }
 0x214   :  { %v1106_v21 = vadd.f32 %v1098_v14, %v3195_v17  ;;  %v1099_v24 = vadd.f32 %v1048_v19, %v1004_v18  ;;  %v1108_v33 = vadd.f32 %v1100_v22, %v3214_v3  ;;  %v1101_v12 = vadd.f32 %v1091_v20, %v1006_v11 }
 0x215   :  { %v1050_v8 = vpop.f32.mrf.mxu0  ;;  %v1093_v7 = vpop.f32.mrf.mxu1  ;;  %v1010_v18 = vunpack.c.h.bf16 %v3843_v34 }
 0x216   :  { %v1114_v6 = vmul.f32 0.5, %v1106_v21  ;;  %v1107_v9 = vadd.f32 %v1099_v24, %v3193_v55  ;;  %v1102_v45 = vadd.f32 %v1050_v8, %v1007_v1  ;;  %v1104_v51 = vadd.f32 %v1093_v7, %v1009_v36 }
 0x217   :  { %v1052_v53 = vpop.f32.mrf.mxu0  ;;  %v1095_v16 = vpop.f32.mrf.mxu1  ;;  %v1109_v19 = vadd.f32 %v1101_v12, %v3218_v59 }
 0x218   :  { %2620 = vtanh.f32 %v1114_v6  ;;  %v1122_v54 = vmul.f32 0.5, %v1107_v9  ;;  %v1103_v60 = vadd.f32 %v1052_v53, %v1008_v0  ;;  %v1110_v61 = vadd.f32 %v1102_v45, %v3195_v17  ;;  %v1158_v45 = vpop.permute.xlu1 %1157 }
 0x219   :  { %v1112_v14 = vadd.f32 %v1104_v51, %v3214_v3  ;;  %v1105_v21 = vadd.f32 %v1095_v16, %v1010_v18  ;;  %v1132_v22 = vmul.f32 0.5, %v1109_v19  ;;  %v994_v53 = vsel %vm990_vm1, %v3223_v42, 0.0 }
 0x21a   :  { %2622 = vtanh.f32 %v1122_v54  ;;  %v1111_v62 = vadd.f32 %v1103_v60, %v3193_v55  ;;  %v1115_v10 = vmul.f32 0.5, %v1110_v61  ;;  %vm1162_vm4 = vcmp.eq.s32.totalorder %v1158_v45, 1  ;;  %v3327_v45 = vld [vmem:[#allocation5 + $0xc4] ss:$16 sps:$4 sm:$0xff]  }
 0x21b   :  { %2624 = vtanh.f32 %v1108_v33  ;;  %v1113_v15 = vadd.f32 %v1105_v21, %v3218_v59 }
 0x21c   :  { %v1123_v13 = vmul.f32 0.5, %v1111_v62  ;;  %2626 = vtanh.f32 %v1115_v10  ;;  %v995_v10 = vsel %vm991_vm2, %v3226_v48, 0.0 }
 0x21d   :  { %v1133_v6 = vmul.f32 0.5, %v1113_v15 }
 0x21e   :  { %2628 = vtanh.f32 %v1123_v13 }
 0x21f   :  { %2630 = vtanh.f32 %v1112_v14  ;;  %v1161_v14 = vpop.permute.xlu1 %1160 }
 0x220   :  { %2632 = vtanh.f32 %v1132_v22  ;;  %vm1163_vm5 = vcmp.eq.s32.totalorder %v1161_v14, 1 }
 0x221   :  { %2634 = vtanh.f32 %v1133_v6 }
 0x225   :  { %v2621_v24 = vpop.eup %2620 }
 0x226   :  { %v1118_v38 = vadd.f32 1.0, %v2621_v24 }
 0x227   :  { %v2623_v1 = vpop.eup %2622 }
 0x228   :  { %v1120_v8 = vmul.f32 0.5, %v1118_v38  ;;  %v1126_v20 = vadd.f32 1.0, %v2623_v1  ;;  %v2625_v9 = vpop.eup %2624  ;;  %v992_v1 = vsel %vm990_vm1, %v3231_v52, 0.0  ;;  %v3324_v52 = vld [vmem:[#allocation5 + $0xe8] ss:$16 sps:$4 sm:$0xff]  }
 0x229   :  { %v2627_v7 = vpop.eup %2626 }
 0x22a   :  { %v1128_v0 = vmul.f32 0.5, %v1126_v20  ;;  %v1142_v36 = vmul.f32 %v2625_v9, %v1120_v8  ;;  %v1119_v33 = vadd.f32 1.0, %v2627_v7  ;;  %v993_v7 = vsel %vm991_vm2, %v3233_v25, 0.0  ;;  %v3330_v25 = vld [vmem:[#allocation5 + $0xcc] ss:$16 sps:$4 sm:$0xff]  }
 0x22b   :  { %v2629_v34 = vpop.eup %2628 }
 0x22c   :  { %v1127_v54 = vadd.f32 1.0, %v2629_v34  ;;  %v1140_v60 = vmul.f32 %v1128_v0, %v994_v53  ;;  %v1121_v61 = vmul.f32 0.5, %v1119_v33  ;;  %v2631_v51 = vpop.eup %2630  ;;  %v3338_v34 = vld [vmem:[#allocation5 + $0xc8] ss:$16 sps:$4 sm:$0xff]   ;;  %v3345_v33 = vld [vmem:[#allocation5 + $0xa0] ss:$16 sps:$4 sm:$0xff]  }
 0x22d   :  { %v2633_v19 = vpop.eup %2632 }
 0x22e   :  { %v1129_v11 = vmul.f32 0.5, %v1127_v54  ;;  %v1144_v62 = vadd.f32 %v1142_v36, %v1140_v60  ;;  %v1143_v12 = vmul.f32 %v2631_v51, %v1121_v61  ;;  %v1136_v21 = vadd.f32 1.0, %v2633_v19  ;;  %v2635_v22 = vpop.eup %2634  ;;  %v3349_v54 = vld [vmem:[#allocation5 + $0x84] ss:$16 sps:$4 sm:$0xff]   ;;  %v3353_v60 = vld [vmem:[#allocation5 + $0x80] ss:$16 sps:$4 sm:$0xff]  }
 0x22f   :  { %v1137_v24 = vadd.f32 1.0, %v2635_v22  ;;  %v3357_v61 = vld [vmem:[#allocation5 + $0x64] ss:$16 sps:$4 sm:$0xff]  }
 0x230   :  { %2636 = vtanh.f32 %v1144_v62  ;;  %v3302_v13 = vsel %vm1162_vm4, %v1144_v62, %v994_v53  ;;  %v1141_v42 = vmul.f32 %v1129_v11, %v995_v10  ;;  %v1138_v15 = vmul.f32 0.5, %v1136_v21  ;;  %v3341_v53 = vld [vmem:[#allocation5 + $0xa4] ss:$16 sps:$4 sm:$0xff]  }
 0x231   :  { %v1139_v8 = vmul.f32 0.5, %v1137_v24 }
 0x232   :  { %v1145_v16 = vadd.f32 %v1143_v12, %v1141_v42  ;;  %v3847_v42 = vld [vmem:[#allocation22_spill] sm:$0xff] }
 0x234   :  { %2638 = vtanh.f32 %v1145_v16  ;;  %v3305_v18 = vsel %vm1163_vm5, %v1145_v16, %v995_v10  ;;  %v1181_v16 = vunpack.c.l.bf16 %v3847_v42 }
 0x23d   :  { %v2637_v38 = vpop.eup %2636 }
 0x23e   :  { %v1148_v48 = vmul.f32 %v2637_v38, %v1138_v15 }
 0x240   :  { %v3311_v20 = vsel %vm1162_vm4, %v1148_v48, %v992_v1 }
 0x241   :  { %v2639_v6 = vpop.eup %2638 }
 0x242   :  { %v1149_v9 = vmul.f32 %v2639_v6, %v1139_v8 }
 0x244   :  { %v3317_v0 = vsel %vm1163_vm5, %v1149_v9, %v993_v7 }
 0x245   :  { %v1183_v36 = vpack.c.bf16 %v3317_v0, %v3311_v20 }
 0x247   :  { %1217 = vmatmul.mubr.bf16.vlgmr.msra.gmra.mxu0 %v1183_v36  ;;  %1260 = vmatmul.mubr.bf16.vlgmr.msra.gmra.mxu1 %v1183_v36 }
 0x248   :  { %1357 = vmatpush1.bf16.msra.mxu0 %v3321_v58  ;;  %1400 = vmatpush1.bf16.msra.mxu1 %v3324_v52 }
 0x249   :  { %1358 = vmatprep.subr.bf16.mxu0 %v3327_v45  ;;  %1401 = vmatprep.subr.bf16.mxu1 %v3330_v25 }
 0x24a   :  { %1388 = vmatprep.mubr.bf16.mxu0 %v3840_v50  ;;  %1431 = vmatprep.mubr.bf16.mxu1 %v3840_v50 }
 0x24c   :  { %1359 = vmatpush1.bf16.msra.mxu0 %v3335_v56  ;;  %1402 = vmatpush1.bf16.msra.mxu1 %v3338_v34 }
 0x24d   :  { %1360 = vmatprep.subr.bf16.mxu0 %v3341_v53  ;;  %1403 = vmatprep.subr.bf16.mxu1 %v2949_v23  ;;  %v3361_v23 = vld [vmem:[#allocation5 + $0x60] ss:$16 sps:$4 sm:$0xff]  }
 0x250   :  { %1361 = vmatpush1.bf16.msra.mxu0 %v3345_v33  ;;  %1404 = vmatpush1.bf16.msra.mxu1 %v2959_v26  ;;  %v3377_v26 = vld [vmem:[#allocation5 + $0xe4] ss:$16 sps:$4 sm:$0xff]  }
 0x251   :  { %1362 = vmatprep.subr.bf16.mxu0 %v3349_v54  ;;  %1405 = vmatprep.subr.bf16.mxu1 %v2967_v29 }
 0x254   :  { %1363 = vmatpush1.bf16.msra.mxu0 %v3353_v60  ;;  %1406 = vmatpush1.bf16.msra.mxu1 %v2977_v32 }
 0x255   :  { %1364 = vmatprep.subr.bf16.mxu0 %v3357_v61  ;;  %1407 = vmatprep.subr.bf16.mxu1 %v2993_v35  ;;  %v3845_v35 = vld [vmem:[#allocation20_spill] sm:$0xff] }
 0x256   :  { %v1178_v48 = vunpack.c.h.bf16 %v3845_v35 }
 0x258   :  { %1365 = vmatpush1.bf16.msra.mxu0 %v3361_v23  ;;  %1408 = vmatpush1.bf16.msra.mxu1 %v3006_v40 }
 0x259   :  { %1366 = vmatprep.subr.bf16.mxu0 %v2961_v27  ;;  %1409 = vmatprep.subr.bf16.mxu1 %v3009_v41  ;;  %v3380_v27 = vld [vmem:[#allocation5 + $0xec] ss:$16 sps:$4 sm:$0xff]  }
 0x25c   :  { %1367 = vmatpush1.bf16.msra.mxu0 %v2964_v28  ;;  %1410 = vmatpush1.bf16.msra.mxu1 %v3020_v43  ;;  %v3844_v28 = vld [vmem:[#allocation13_spill] sm:$0xff] }
 0x25d   :  { %1368 = vmatprep.subr.bf16.mxu0 %v2971_v30  ;;  %1411 = vmatprep.subr.bf16.mxu1 %v3024_v44  ;;  %v1175_v29 = vunpack.c.l.bf16 %v3844_v28  ;;  %v1176_v40 = vunpack.c.h.bf16 %v3844_v28  ;;  %v1182_v28 = vunpack.c.h.bf16 %v3847_v42  ;;  %v1330_v42 = vpop.permute.xlu0 %1329 }
 0x25e   :  { %vm1334_vm6 = vcmp.eq.s32.totalorder %v1330_v42, 1  ;;  %v3848_v42 = vld [vmem:[#allocation15_spill] sm:$0xff] }
 0x260   :  { %1369 = vmatpush1.bf16.msra.mxu0 %v2975_v31  ;;  %1412 = vmatpush1.bf16.msra.mxu1 %v3032_v46 }
 0x261   :  { %1370 = vmatprep.subr.bf16.mxu0 %v3001_v37  ;;  %1413 = vmatprep.subr.bf16.mxu1 %v3035_v47  ;;  %v1177_v37 = vunpack.c.l.bf16 %v3845_v35  ;;  %v3846_v47 = vld [vmem:[#allocation14_spill] sm:$0xff] }
 0x262   :  { %v1180_v12 = vunpack.c.h.bf16 %v3846_v47 }
 0x264   :  { %1371 = vmatpush1.bf16.msra.mxu0 %v3004_v39  ;;  %1414 = vmatpush1.bf16.msra.mxu1 %v3044_v49  ;;  %v1179_v49 = vunpack.c.l.bf16 %v3846_v47 }
 0x265   :  { %1528 = vmatprep.subr.bf16.mxu0 %v3377_v26  ;;  %1571 = vmatprep.subr.bf16.mxu1 %v3380_v27 }
 0x307   :  { %v1218_v30 = vpop.f32.mrf.mxu0  ;;  %v1261_v31 = vpop.f32.mrf.mxu1 }
 0x308   :  { %v1270_v32 = vadd.f32 %v1218_v30, %v1175_v29  ;;  %v1272_v44 = vadd.f32 %v1261_v31, %v1177_v37 }
 0x309   :  { %v1220_v39 = vpop.f32.mrf.mxu0  ;;  %v1263_v41 = vpop.f32.mrf.mxu1 }
 0x30a   :  { %v1278_v43 = vadd.f32 %v1270_v32, %v3195_v17  ;;  %v1271_v46 = vadd.f32 %v1220_v39, %v1176_v40  ;;  %v1280_v21 = vadd.f32 %v1272_v44, %v3214_v3  ;;  %v1273_v6 = vadd.f32 %v1263_v41, %v1178_v48 }
 0x30b   :  { %v1222_v51 = vpop.f32.mrf.mxu0  ;;  %v1265_v10 = vpop.f32.mrf.mxu1 }
 0x30c   :  { %v1286_v11 = vmul.f32 0.5, %v1278_v43  ;;  %v1279_v62 = vadd.f32 %v1271_v46, %v3193_v55  ;;  %v1274_v14 = vadd.f32 %v1222_v51, %v1179_v49  ;;  %v1276_v38 = vadd.f32 %v1265_v10, %v1181_v16 }
 0x30d   :  { %v1224_v19 = vpop.f32.mrf.mxu0  ;;  %v1267_v36 = vpop.f32.mrf.mxu1  ;;  %v1281_v29 = vadd.f32 %v1273_v6, %v3218_v59 }
 0x30e   :  { %2640 = vtanh.f32 %v1286_v11  ;;  %v1294_v22 = vmul.f32 0.5, %v1279_v62  ;;  %v1275_v15 = vadd.f32 %v1224_v19, %v1180_v12  ;;  %v1282_v24 = vadd.f32 %v1274_v14, %v3195_v17 }
 0x30f   :  { %v1284_v7 = vadd.f32 %v1276_v38, %v3214_v3  ;;  %v1277_v30 = vadd.f32 %v1267_v36, %v1182_v28  ;;  %v1304_v31 = vmul.f32 0.5, %v1281_v29 }
 0x310   :  { %2642 = vtanh.f32 %v1294_v22  ;;  %v1283_v1 = vadd.f32 %v1275_v15, %v3193_v55  ;;  %v1287_v8 = vmul.f32 0.5, %v1282_v24  ;;  %v1333_v24 = vpop.permute.xlu1 %1332 }
 0x311   :  { %2644 = vtanh.f32 %v1280_v21  ;;  %v1285_v32 = vadd.f32 %v1277_v30, %v3218_v59  ;;  %vm1335_vm7 = vcmp.eq.s32.totalorder %v1333_v24, 1  ;;  %v3849_v24 = vld [vmem:[#allocation24_spill] sm:$0xff] }
 0x312   :  { %v1295_v9 = vmul.f32 0.5, %v1283_v1  ;;  %2646 = vtanh.f32 %v1287_v8 }
 0x313   :  { %v1305_v43 = vmul.f32 0.5, %v1285_v32 }
 0x314   :  { %2648 = vtanh.f32 %v1295_v9 }
 0x315   :  { %2650 = vtanh.f32 %v1284_v7 }
 0x316   :  { %2652 = vtanh.f32 %v1304_v31 }
 0x317   :  { %2654 = vtanh.f32 %v1305_v43  ;;  %v3452_v43 = vld [vmem:[#allocation5 + $0x4c] ss:$16 sps:$4 sm:$0xff]  }
 0x31b   :  { %v2641_v35 = vpop.eup %2640 }
 0x31c   :  { %v1290_v37 = vadd.f32 1.0, %v2641_v35  ;;  %v3434_v35 = vld [vmem:[#allocation5 + $0x8c] ss:$16 sps:$4 sm:$0xff]  }
 0x31d   :  { %v2643_v40 = vpop.eup %2642 }
 0x31e   :  { %v1292_v39 = vmul.f32 0.5, %v1290_v37  ;;  %v1298_v41 = vadd.f32 1.0, %v2643_v40  ;;  %v2645_v44 = vpop.eup %2644  ;;  %v3438_v37 = vld [vmem:[#allocation5 + $0x88] ss:$16 sps:$4 sm:$0xff]   ;;  %v3442_v40 = vld [vmem:[#allocation5 + $0x6c] ss:$16 sps:$4 sm:$0xff]  }
 0x31f   :  { %v2647_v46 = vpop.eup %2646 }
 0x320   :  { %v1300_v47 = vmul.f32 0.5, %v1298_v41  ;;  %v1314_v49 = vmul.f32 %v2645_v44, %v1292_v39  ;;  %v1291_v11 = vadd.f32 1.0, %v2647_v46  ;;  %v3446_v39 = vld [vmem:[#allocation5 + $0x68] ss:$16 sps:$4 sm:$0xff]   ;;  %v3449_v41 = vld [vmem:[#allocation5 + $0x44] ss:$16 sps:$4 sm:$0xff]  }
 0x321   :  { %v2649_v51 = vpop.eup %2648  ;;  %v3455_v44 = vld [vmem:[#allocation5 + $0x40] ss:$16 sps:$4 sm:$0xff]   ;;  %v3458_v46 = vld [vmem:[#allocation5 + $0x48] ss:$16 sps:$4 sm:$0xff]  }
 0x322   :  { %v1312_v62 = vmul.f32 %v1300_v47, %v3302_v13  ;;  %v1299_v10 = vadd.f32 1.0, %v2649_v51  ;;  %v1293_v12 = vmul.f32 0.5, %v1291_v11  ;;  %v2651_v14 = vpop.eup %2650  ;;  %v3461_v47 = vld [vmem:[#allocation5 + $0x24] ss:$16 sps:$4 sm:$0xff]   ;;  %v3467_v51 = vld [vmem:[#allocation5 + $0x20] ss:$16 sps:$4 sm:$0xff]  }
 0x323   :  { %v2653_v1 = vpop.eup %2652  ;;  %v3470_v11 = vld [vmem:[#allocation5 + $0x28] ss:$16 sps:$4 sm:$0xff]  }
 0x324   :  { %v1316_v16 = vadd.f32 %v1314_v49, %v1312_v62  ;;  %v1301_v19 = vmul.f32 0.5, %v1299_v10  ;;  %v1315_v21 = vmul.f32 %v2651_v14, %v1293_v12  ;;  %v1308_v8 = vadd.f32 1.0, %v2653_v1  ;;  %v2655_v6 = vpop.eup %2654  ;;  %v3464_v49 = vld [vmem:[#allocation5 + $0x2c] ss:$16 sps:$4 sm:$0xff]   ;;  %v3473_v62 = vld [vmem:[#allocation5 + $0x4] ss:$16 sps:$4 sm:$0xff]  }
 0x325   :  { %v1309_v7 = vadd.f32 1.0, %v2655_v6  ;;  %v3476_v10 = vld [vmem:[#allocation5 + $0xc] ss:$16 sps:$4 sm:$0xff]   ;;  %v3479_v12 = vld [vmem:[#allocation5] ss:$16 sps:$4 sm:$0xff]   ;;  %v1348_v1 = vunpack.c.h.bf16 %v3848_v42 }
 0x326   :  { %2656 = vtanh.f32 %v1316_v16  ;;  %v1313_v22 = vmul.f32 %v1301_v19, %v3305_v18  ;;  %v3403_v15 = vsel %vm1334_vm6, %v1316_v16, %v3302_v13  ;;  %v1310_v9 = vmul.f32 0.5, %v1308_v8  ;;  %v3482_v14 = vld [vmem:[#allocation5 + $0x8] ss:$16 sps:$4 sm:$0xff]  }
 0x327   :  { %v1311_v29 = vmul.f32 0.5, %v1309_v7  ;;  %v1347_v16 = vunpack.c.l.bf16 %v3848_v42 }
 0x328   :  { %v1317_v38 = vadd.f32 %v1315_v21, %v1313_v22 }
 0x32a   :  { %2658 = vtanh.f32 %v1317_v38  ;;  %v3406_v48 = vsel %vm1335_vm7, %v1317_v38, %v3305_v18  ;;  %v1349_v38 = vunpack.c.l.bf16 %v3849_v24 }
 0x333   :  { %v2657_v36 = vpop.eup %2656 }
 0x334   :  { %v1320_v28 = vmul.f32 %v2657_v36, %v1310_v9 }
 0x336   :  { %v3410_v13 = vsel %vm1334_vm6, %v1320_v28, %v3311_v20  ;;  %v3426_v20 = vld [vmem:[#allocation5 + $0xac] ss:$16 sps:$4 sm:$0xff]  }
 0x337   :  { %v2659_v30 = vpop.eup %2658  ;;  %v3850_v28 = vld [vmem:[#allocation17_spill] sm:$0xff] }
 0x338   :  { %v1321_v31 = vmul.f32 %v2659_v30, %v1311_v29  ;;  %v1351_v29 = vunpack.c.l.bf16 %v3850_v28  ;;  %v1352_v5 = vunpack.c.h.bf16 %v3850_v28 }
 0x33a   :  { %v3413_v32 = vsel %vm1335_vm7, %v1321_v31, %v3317_v0  ;;  %v3430_v0 = vld [vmem:[#allocation5 + $0xa8] ss:$16 sps:$4 sm:$0xff]  }
 0x33b   :  { %v1355_v18 = vpack.c.bf16 %v3413_v32, %v3410_v13 }
 0x33d   :  { %1389 = vmatmul.mubr.bf16.vlgmr.msra.gmra.mxu0 %v1355_v18  ;;  %1432 = vmatmul.mubr.bf16.vlgmr.msra.gmra.mxu1 %v1355_v18 }
 0x33e   :  { %1529 = vmatpush1.bf16.msra.mxu0 %v3321_v58  ;;  %1572 = vmatpush1.bf16.msra.mxu1 %v3324_v52 }
 0x33f   :  { %1530 = vmatprep.subr.bf16.mxu0 %v3327_v45  ;;  %1573 = vmatprep.subr.bf16.mxu1 %v3330_v25 }
 0x340   :  { %1560 = vmatprep.mubr.bf16.mxu0 %v3840_v50  ;;  %1603 = vmatprep.mubr.bf16.mxu1 %v3840_v50 }
 0x342   :  { %1531 = vmatpush1.bf16.msra.mxu0 %v3335_v56  ;;  %1574 = vmatpush1.bf16.msra.mxu1 %v3338_v34 }
 0x343   :  { %1532 = vmatprep.subr.bf16.mxu0 %v3341_v53  ;;  %1575 = vmatprep.subr.bf16.mxu1 %v3426_v20 }
 0x346   :  { %1533 = vmatpush1.bf16.msra.mxu0 %v3345_v33  ;;  %1576 = vmatpush1.bf16.msra.mxu1 %v3430_v0 }
 0x347   :  { %1534 = vmatprep.subr.bf16.mxu0 %v3349_v54  ;;  %1577 = vmatprep.subr.bf16.mxu1 %v3434_v35 }
 0x34a   :  { %1535 = vmatpush1.bf16.msra.mxu0 %v3353_v60  ;;  %1578 = vmatpush1.bf16.msra.mxu1 %v3438_v37 }
 0x34b   :  { %1536 = vmatprep.subr.bf16.mxu0 %v3357_v61  ;;  %1579 = vmatprep.subr.bf16.mxu1 %v3442_v40 }
 0x34e   :  { %1537 = vmatpush1.bf16.msra.mxu0 %v3361_v23  ;;  %1580 = vmatpush1.bf16.msra.mxu1 %v3446_v39 }
 0x34f   :  { %1538 = vmatprep.subr.bf16.mxu0 %v3449_v41  ;;  %1581 = vmatprep.subr.bf16.mxu1 %v3452_v43 }
 0x352   :  { %1539 = vmatpush1.bf16.msra.mxu0 %v3455_v44  ;;  %1582 = vmatpush1.bf16.msra.mxu1 %v3458_v46 }
 0x353   :  { %1540 = vmatprep.subr.bf16.mxu0 %v3461_v47  ;;  %1583 = vmatprep.subr.bf16.mxu1 %v3464_v49 }
 0x356   :  { %1541 = vmatpush1.bf16.msra.mxu0 %v3467_v51  ;;  %1584 = vmatpush1.bf16.msra.mxu1 %v3470_v11 }
 0x357   :  { %1542 = vmatprep.subr.bf16.mxu0 %v3473_v62  ;;  %1585 = vmatprep.subr.bf16.mxu1 %v3476_v10 }
 0x35a   :  { %1543 = vmatpush1.bf16.msra.mxu0 %v3479_v12  ;;  %1586 = vmatpush1.bf16.msra.mxu1 %v3482_v14 }
 0x35b   :  { %1700 = vmatprep.subr.bf16.mxu0 %v3377_v26  ;;  %1743 = vmatprep.subr.bf16.mxu1 %v3380_v27 }
 0x3fd   :  { %v1390_v19 = vpop.f32.mrf.mxu0  ;;  %v1433_v21 = vpop.f32.mrf.mxu1 }
 0x3fe   :  { %v1442_v22 = vadd.f32 %v1390_v19, %v1347_v16  ;;  %v1444_v7 = vadd.f32 %v1433_v21, %v1349_v38  ;;  %v3851_v19 = vld [vmem:[#allocation26_spill] sm:$0xff] }
 0x3ff   :  { %v1392_v8 = vpop.f32.mrf.mxu0  ;;  %v1435_v6 = vpop.f32.mrf.mxu1  ;;  %v1353_v4 = vunpack.c.l.bf16 %v3851_v19 }
 0x400   :  { %v1450_v9 = vadd.f32 %v1442_v22, %v3195_v17  ;;  %v1443_v36 = vadd.f32 %v1392_v8, %v1348_v1  ;;  %v1452_v42 = vadd.f32 %v1444_v7, %v3214_v3  ;;  %v1350_v1 = vunpack.c.h.bf16 %v3849_v24 }
 0x401   :  { %v1394_v30 = vpop.f32.mrf.mxu0  ;;  %v1437_v2 = vpop.f32.mrf.mxu1  ;;  %v1354_v7 = vunpack.c.h.bf16 %v3851_v19 }
 0x402   :  { %v1458_v31 = vmul.f32 0.5, %v1450_v9  ;;  %v1451_v18 = vadd.f32 %v1443_v36, %v3193_v55  ;;  %v1446_v16 = vadd.f32 %v1394_v30, %v1351_v29  ;;  %v1448_v38 = vadd.f32 %v1437_v2, %v1353_v4 }
 0x403   :  { %v1396_v63 = vpop.f32.mrf.mxu0  ;;  %v1445_v36 = vadd.f32 %v1435_v6, %v1350_v1  ;;  %v1439_v30 = vpop.f32.mrf.mxu1 }
 0x404   :  { %2660 = vtanh.f32 %v1458_v31  ;;  %v1466_v57 = vmul.f32 0.5, %v1451_v18  ;;  %v1447_v22 = vadd.f32 %v1396_v63, %v1352_v5  ;;  %v1454_v21 = vadd.f32 %v1446_v16, %v3195_v17 }
 0x405   :  { %v1456_v29 = vadd.f32 %v1448_v38, %v3214_v3  ;;  %v1453_v63 = vadd.f32 %v1445_v36, %v3218_v59  ;;  %v1449_v5 = vadd.f32 %v1439_v30, %v1354_v7 }
 0x406   :  { %2662 = vtanh.f32 %v1466_v57  ;;  %v1455_v8 = vadd.f32 %v1447_v22, %v3193_v55  ;;  %v1459_v9 = vmul.f32 0.5, %v1454_v21 }
 0x407   :  { %2664 = vtanh.f32 %v1452_v42  ;;  %v1476_v57 = vmul.f32 0.5, %v1453_v63  ;;  %v1457_v4 = vadd.f32 %v1449_v5, %v3218_v59 }
 0x408   :  { %v1467_v28 = vmul.f32 0.5, %v1455_v8  ;;  %2666 = vtanh.f32 %v1459_v9 }
 0x409   :  { %v1477_v16 = vmul.f32 0.5, %v1457_v4  ;;  %v1505_v4 = vpop.permute.xlu1 %1504 }
 0x40a   :  { %2668 = vtanh.f32 %v1467_v28  ;;  %vm1507_vm9 = vcmp.eq.s32.totalorder %v1505_v4, 1 }
 0x40b   :  { %2670 = vtanh.f32 %v1456_v29  ;;  %v1502_v29 = vpop.permute.xlu0 %1501 }
 0x40c   :  { %2672 = vtanh.f32 %v1476_v57  ;;  %vm1506_vm8 = vcmp.eq.s32.totalorder %v1502_v29, 1  ;;  %v3853_v29 = vld [vmem:[#allocation27_spill] sm:$0xff] }
 0x40d   :  { %2674 = vtanh.f32 %v1477_v16 }
 0x411   :  { %v2661_v2 = vpop.eup %2660 }
 0x412   :  { %v1462_v24 = vadd.f32 1.0, %v2661_v2 }
 0x413   :  { %v2663_v31 = vpop.eup %2662 }
 0x414   :  { %v1464_v18 = vmul.f32 0.5, %v1462_v24  ;;  %v1470_v6 = vadd.f32 1.0, %v2663_v31  ;;  %v2665_v42 = vpop.eup %2664 }
 0x415   :  { %v2667_v22 = vpop.eup %2666 }
 0x416   :  { %v1472_v21 = vmul.f32 0.5, %v1470_v6  ;;  %v1486_v38 = vmul.f32 %v2665_v42, %v1464_v18  ;;  %v1463_v19 = vadd.f32 1.0, %v2667_v22 }
 0x417   :  { %v2669_v1 = vpop.eup %2668 }
 0x418   :  { %v1484_v8 = vmul.f32 %v1472_v21, %v3403_v15  ;;  %v1471_v9 = vadd.f32 1.0, %v2669_v1  ;;  %v1465_v36 = vmul.f32 0.5, %v1463_v19  ;;  %v2671_v28 = vpop.eup %2670 }
 0x419   :  { %v2673_v31 = vpop.eup %2672 }
 0x41a   :  { %v1488_v30 = vadd.f32 %v1486_v38, %v1484_v8  ;;  %v1473_v7 = vmul.f32 0.5, %v1471_v9  ;;  %v1487_v63 = vmul.f32 %v2671_v28, %v1465_v36  ;;  %v1480_v18 = vadd.f32 1.0, %v2673_v31  ;;  %v2675_v6 = vpop.eup %2674 }
 0x41b   :  { %v1481_v42 = vadd.f32 1.0, %v2675_v6 }
 0x41c   :  { %2676 = vtanh.f32 %v1488_v30  ;;  %v1485_v5 = vmul.f32 %v1473_v7, %v3406_v48  ;;  %v3507_v57 = vsel %vm1506_vm8, %v1488_v30, %v3403_v15  ;;  %v1482_v16 = vmul.f32 0.5, %v1480_v18  ;;  %v3854_v18 = vld [vmem:[#allocation21_spill] sm:$0xff] }
 0x41d   :  { %v1483_v38 = vmul.f32 0.5, %v1481_v42  ;;  %v1521_v30 = vunpack.c.l.bf16 %v3853_v29  ;;  %v1523_v6 = vunpack.c.l.bf16 %v3854_v18 }
 0x41e   :  { %v1489_v2 = vadd.f32 %v1487_v63, %v1485_v5 }
 0x420   :  { %2678 = vtanh.f32 %v1489_v2  ;;  %v3510_v24 = vsel %vm1507_vm9, %v1489_v2, %v3406_v48 }
 0x429   :  { %v2677_v22 = vpop.eup %2676 }
 0x42a   :  { %v1492_v21 = vmul.f32 %v2677_v22, %v1482_v16 }
 0x42c   :  { %v3514_v15 = vsel %vm1506_vm8, %v1492_v21, %v3410_v13  ;;  %v3852_v13 = vld [vmem:[#allocation19_spill] sm:$0xff] }
 0x42d   :  { %v2679_v1 = vpop.eup %2678  ;;  %v1520_v7 = vunpack.c.h.bf16 %v3852_v13 }
 0x42e   :  { %v1493_v19 = vmul.f32 %v2679_v1, %v1483_v38  ;;  %v1524_v38 = vunpack.c.h.bf16 %v3854_v18 }
 0x430   :  { %v3517_v8 = vsel %vm1507_vm9, %v1493_v19, %v3413_v32  ;;  %v1519_v32 = vunpack.c.l.bf16 %v3852_v13  ;;  %v3855_v19 = vld [vmem:[#allocation28_spill] sm:$0xff] }
 0x431   :  { %v1527_v48 = vpack.c.bf16 %v3517_v8, %v3514_v15 }
 0x433   :  { %1561 = vmatmul.mubr.bf16.vlgmr.msra.gmra.mxu0 %v1527_v48  ;;  %1604 = vmatmul.mubr.bf16.vlgmr.msra.gmra.mxu1 %v1527_v48  ;;  %v1525_v48 = vunpack.c.l.bf16 %v3855_v19 }
 0x434   :  { %1701 = vmatpush1.bf16.msra.mxu0 %v3321_v58  ;;  %1744 = vmatpush1.bf16.msra.mxu1 %v3324_v52 }
 0x435   :  { %1702 = vmatprep.subr.bf16.mxu0 %v3327_v45  ;;  %1745 = vmatprep.subr.bf16.mxu1 %v3330_v25 }
 0x436   :  { %1732 = vmatprep.mubr.bf16.mxu0 %v3840_v50  ;;  %1775 = vmatprep.mubr.bf16.mxu1 %v3840_v50 }
 0x438   :  { %1703 = vmatpush1.bf16.msra.mxu0 %v3335_v56  ;;  %1746 = vmatpush1.bf16.msra.mxu1 %v3338_v34 }
 0x439   :  { %1704 = vmatprep.subr.bf16.mxu0 %v3341_v53  ;;  %1747 = vmatprep.subr.bf16.mxu1 %v3426_v20 }
 0x43c   :  { %1705 = vmatpush1.bf16.msra.mxu0 %v3345_v33  ;;  %1748 = vmatpush1.bf16.msra.mxu1 %v3430_v0 }
 0x43d   :  { %1706 = vmatprep.subr.bf16.mxu0 %v3349_v54  ;;  %1749 = vmatprep.subr.bf16.mxu1 %v3434_v35 }
 0x440   :  { %1707 = vmatpush1.bf16.msra.mxu0 %v3353_v60  ;;  %1750 = vmatpush1.bf16.msra.mxu1 %v3438_v37 }
 0x441   :  { %1708 = vmatprep.subr.bf16.mxu0 %v3357_v61  ;;  %1751 = vmatprep.subr.bf16.mxu1 %v3442_v40 }
 0x444   :  { %1709 = vmatpush1.bf16.msra.mxu0 %v3361_v23  ;;  %1752 = vmatpush1.bf16.msra.mxu1 %v3446_v39 }
 0x445   :  { %1710 = vmatprep.subr.bf16.mxu0 %v3449_v41  ;;  %1753 = vmatprep.subr.bf16.mxu1 %v3452_v43 }
 0x448   :  { %1711 = vmatpush1.bf16.msra.mxu0 %v3455_v44  ;;  %1754 = vmatpush1.bf16.msra.mxu1 %v3458_v46 }
 0x449   :  { %1712 = vmatprep.subr.bf16.mxu0 %v3461_v47  ;;  %1755 = vmatprep.subr.bf16.mxu1 %v3464_v49 }
 0x44c   :  { %1713 = vmatpush1.bf16.msra.mxu0 %v3467_v51  ;;  %1756 = vmatpush1.bf16.msra.mxu1 %v3470_v11 }
 0x44d   :  { %1714 = vmatprep.subr.bf16.mxu0 %v3473_v62  ;;  %1757 = vmatprep.subr.bf16.mxu1 %v3476_v10 }
 0x450   :  { %1715 = vmatpush1.bf16.msra.mxu0 %v3479_v12  ;;  %1758 = vmatpush1.bf16.msra.mxu1 %v3482_v14 }
 0x451   :  { %1872 = vmatprep.subr.bf16.mxu0 %v3377_v26  ;;  %1915 = vmatprep.subr.bf16.mxu1 %v3380_v27 }
 0x4f3   :  { %v1562_v9 = vpop.f32.mrf.mxu0  ;;  %v1605_v36 = vpop.f32.mrf.mxu1 }
 0x4f4   :  { %v1614_v28 = vadd.f32 %v1562_v9, %v1519_v32  ;;  %v1616_v2 = vadd.f32 %v1605_v36, %v1521_v30 }
 0x4f5   :  { %v1564_v63 = vpop.f32.mrf.mxu0  ;;  %v1607_v5 = vpop.f32.mrf.mxu1 }
 0x4f6   :  { %v1622_v4 = vadd.f32 %v1614_v28, %v3195_v17  ;;  %v1615_v31 = vadd.f32 %v1564_v63, %v1520_v7  ;;  %v1624_v13 = vadd.f32 %v1616_v2, %v3214_v3  ;;  %v1522_v7 = vunpack.c.h.bf16 %v3853_v29 }
 0x4f7   :  { %v1566_v16 = vpop.f32.mrf.mxu0  ;;  %v1609_v21 = vpop.f32.mrf.mxu1  ;;  %v1526_v2 = vunpack.c.h.bf16 %v3855_v19 }
 0x4f8   :  { %v1630_v42 = vmul.f32 0.5, %v1622_v4  ;;  %v1623_v22 = vadd.f32 %v1615_v31, %v3193_v55  ;;  %v1618_v1 = vadd.f32 %v1566_v16, %v1523_v6  ;;  %v1620_v30 = vadd.f32 %v1609_v21, %v1525_v48 }
 0x4f9   :  { %v1568_v32 = vpop.f32.mrf.mxu0  ;;  %v1617_v31 = vadd.f32 %v1607_v5, %v1522_v7  ;;  %v1611_v16 = vpop.f32.mrf.mxu1 }
 0x4fa   :  { %2680 = vtanh.f32 %v1630_v42  ;;  %v1638_v9 = vmul.f32 0.5, %v1623_v22  ;;  %v1619_v28 = vadd.f32 %v1568_v32, %v1524_v38  ;;  %v1626_v36 = vadd.f32 %v1618_v1, %v3195_v17 }
 0x4fb   :  { %v1628_v6 = vadd.f32 %v1620_v30, %v3214_v3  ;;  %v1625_v42 = vadd.f32 %v1617_v31, %v3218_v59  ;;  %v1621_v22 = vadd.f32 %v1611_v16, %v1526_v2 }
 0x4fc   :  { %2682 = vtanh.f32 %v1638_v9  ;;  %v1627_v63 = vadd.f32 %v1619_v28, %v3193_v55  ;;  %v1631_v4 = vmul.f32 0.5, %v1626_v36 }
 0x4fd   :  { %2684 = vtanh.f32 %v1624_v13  ;;  %v1648_v21 = vmul.f32 0.5, %v1625_v42  ;;  %v1629_v29 = vadd.f32 %v1621_v22, %v3218_v59 }
 0x4fe   :  { %v1639_v18 = vmul.f32 0.5, %v1627_v63  ;;  %2686 = vtanh.f32 %v1631_v4 }
 0x4ff   :  { %v1649_v13 = vmul.f32 0.5, %v1629_v29  ;;  %v1677_v29 = vpop.permute.xlu1 %1676 }
 0x500   :  { %2688 = vtanh.f32 %v1639_v18  ;;  %vm1679_vm11 = vcmp.eq.s32.totalorder %v1677_v29, 1 }
 0x501   :  { %2690 = vtanh.f32 %v1628_v6  ;;  %v1674_v6 = vpop.permute.xlu0 %1673 }
 0x502   :  { %2692 = vtanh.f32 %v1648_v21  ;;  %vm1678_vm10 = vcmp.eq.s32.totalorder %v1674_v6, 1  ;;  %v3857_v6 = vld [vmem:[#allocation29_spill] sm:$0xff] }
 0x503   :  { %2694 = vtanh.f32 %v1649_v13 }
 0x507   :  { %v2681_v38 = vpop.eup %2680 }
 0x508   :  { %v1634_v1 = vadd.f32 1.0, %v2681_v38 }
 0x509   :  { %v2683_v48 = vpop.eup %2682 }
 0x50a   :  { %v1636_v32 = vmul.f32 0.5, %v1634_v1  ;;  %v1642_v5 = vadd.f32 1.0, %v2683_v48  ;;  %v2685_v9 = vpop.eup %2684 }
 0x50b   :  { %v2687_v28 = vpop.eup %2686 }
 0x50c   :  { %v1644_v36 = vmul.f32 0.5, %v1642_v5  ;;  %v1658_v30 = vmul.f32 %v2685_v9, %v1636_v32  ;;  %v1635_v19 = vadd.f32 1.0, %v2687_v28 }
 0x50d   :  { %v2689_v7 = vpop.eup %2688 }
 0x50e   :  { %v1656_v63 = vmul.f32 %v1644_v36, %v3507_v57  ;;  %v1643_v4 = vadd.f32 1.0, %v2689_v7  ;;  %v1637_v31 = vmul.f32 0.5, %v1635_v19  ;;  %v2691_v18 = vpop.eup %2690 }
 0x50f   :  { %v2693_v48 = vpop.eup %2692 }
 0x510   :  { %v1660_v16 = vadd.f32 %v1658_v30, %v1656_v63  ;;  %v1645_v2 = vmul.f32 0.5, %v1643_v4  ;;  %v1659_v42 = vmul.f32 %v2691_v18, %v1637_v31  ;;  %v1652_v32 = vadd.f32 1.0, %v2693_v48  ;;  %v2695_v5 = vpop.eup %2694 }
 0x511   :  { %v1653_v9 = vadd.f32 1.0, %v2695_v5 }
 0x512   :  { %2696 = vtanh.f32 %v1660_v16  ;;  %v1657_v22 = vmul.f32 %v1645_v2, %v3510_v24  ;;  %v3575_v21 = vsel %vm1678_vm10, %v1660_v16, %v3507_v57  ;;  %v1654_v13 = vmul.f32 0.5, %v1652_v32  ;;  %v3858_v32 = vld [vmem:[#allocation25_spill] sm:$0xff] }
 0x513   :  { %v1655_v30 = vmul.f32 0.5, %v1653_v9  ;;  %v1693_v16 = vunpack.c.l.bf16 %v3857_v6  ;;  %v1695_v5 = vunpack.c.l.bf16 %v3858_v32 }
 0x514   :  { %v1661_v38 = vadd.f32 %v1659_v42, %v1657_v22 }
 0x516   :  { %2698 = vtanh.f32 %v1661_v38  ;;  %v3578_v1 = vsel %vm1679_vm11, %v1661_v38, %v3510_v24 }
 0x51f   :  { %v2697_v28 = vpop.eup %2696 }
 0x520   :  { %v1664_v36 = vmul.f32 %v2697_v28, %v1654_v13  ;;  %v1696_v28 = vunpack.c.h.bf16 %v3858_v32 }
 0x522   :  { %v3582_v57 = vsel %vm1678_vm10, %v1664_v36, %v3514_v15  ;;  %v3856_v15 = vld [vmem:[#allocation23_spill] sm:$0xff] }
 0x523   :  { %v2699_v7 = vpop.eup %2698  ;;  %v1692_v2 = vunpack.c.h.bf16 %v3856_v15 }
 0x524   :  { %v1665_v19 = vmul.f32 %v2699_v7, %v1655_v30  ;;  %v3859_v30 = vld [vmem:[#allocation30_spill] sm:$0xff] }
 0x525   :  { %v1697_v7 = vunpack.c.l.bf16 %v3859_v30 }
 0x526   :  { %v3585_v63 = vsel %vm1679_vm11, %v1665_v19, %v3517_v8  ;;  %v1691_v8 = vunpack.c.l.bf16 %v3856_v15 }
 0x527   :  { %v1699_v24 = vpack.c.bf16 %v3585_v63, %v3582_v57 }
 0x529   :  { %1733 = vmatmul.mubr.bf16.vlgmr.msra.gmra.mxu0 %v1699_v24  ;;  %1776 = vmatmul.mubr.bf16.vlgmr.msra.gmra.mxu1 %v1699_v24 }
 0x52a   :  { %1873 = vmatpush1.bf16.msra.mxu0 %v3321_v58  ;;  %1916 = vmatpush1.bf16.msra.mxu1 %v3324_v52 }
 0x52b   :  { %1874 = vmatprep.subr.bf16.mxu0 %v3327_v45  ;;  %1917 = vmatprep.subr.bf16.mxu1 %v3330_v25 }
 0x52c   :  { %1904 = vmatprep.mubr.bf16.mxu0 %v3840_v50  ;;  %1947 = vmatprep.mubr.bf16.mxu1 %v3840_v50 }
 0x52e   :  { %1875 = vmatpush1.bf16.msra.mxu0 %v3335_v56  ;;  %1918 = vmatpush1.bf16.msra.mxu1 %v3338_v34 }
 0x52f   :  { %1876 = vmatprep.subr.bf16.mxu0 %v3341_v53  ;;  %1919 = vmatprep.subr.bf16.mxu1 %v3426_v20 }
 0x532   :  { %1877 = vmatpush1.bf16.msra.mxu0 %v3345_v33  ;;  %1920 = vmatpush1.bf16.msra.mxu1 %v3430_v0 }
 0x533   :  { %1878 = vmatprep.subr.bf16.mxu0 %v3349_v54  ;;  %1921 = vmatprep.subr.bf16.mxu1 %v3434_v35 }
 0x536   :  { %1879 = vmatpush1.bf16.msra.mxu0 %v3353_v60  ;;  %1922 = vmatpush1.bf16.msra.mxu1 %v3438_v37 }
 0x537   :  { %1880 = vmatprep.subr.bf16.mxu0 %v3357_v61  ;;  %1923 = vmatprep.subr.bf16.mxu1 %v3442_v40 }
 0x53a   :  { %1881 = vmatpush1.bf16.msra.mxu0 %v3361_v23  ;;  %1924 = vmatpush1.bf16.msra.mxu1 %v3446_v39 }
 0x53b   :  { %1882 = vmatprep.subr.bf16.mxu0 %v3449_v41  ;;  %1925 = vmatprep.subr.bf16.mxu1 %v3452_v43 }
 0x53e   :  { %1883 = vmatpush1.bf16.msra.mxu0 %v3455_v44  ;;  %1926 = vmatpush1.bf16.msra.mxu1 %v3458_v46 }
 0x53f   :  { %1884 = vmatprep.subr.bf16.mxu0 %v3461_v47  ;;  %1927 = vmatprep.subr.bf16.mxu1 %v3464_v49 }
 0x542   :  { %1885 = vmatpush1.bf16.msra.mxu0 %v3467_v51  ;;  %1928 = vmatpush1.bf16.msra.mxu1 %v3470_v11 }
 0x543   :  { %1886 = vmatprep.subr.bf16.mxu0 %v3473_v62  ;;  %1929 = vmatprep.subr.bf16.mxu1 %v3476_v10 }
 0x546   :  { %1887 = vmatpush1.bf16.msra.mxu0 %v3479_v12  ;;  %1930 = vmatpush1.bf16.msra.mxu1 %v3482_v14 }
 0x547   :  { %2044 = vmatprep.subr.bf16.mxu0 %v3377_v26  ;;  %2087 = vmatprep.subr.bf16.mxu1 %v3380_v27 }
 0x5e9   :  { %v1734_v4 = vpop.f32.mrf.mxu0  ;;  %v1777_v31 = vpop.f32.mrf.mxu1 }
 0x5ea   :  { %v1786_v18 = vadd.f32 %v1734_v4, %v1691_v8  ;;  %v1788_v38 = vadd.f32 %v1777_v31, %v1693_v16 }
 0x5eb   :  { %v1736_v42 = vpop.f32.mrf.mxu0  ;;  %v1779_v22 = vpop.f32.mrf.mxu1 }
 0x5ec   :  { %v1794_v29 = vadd.f32 %v1786_v18, %v3195_v17  ;;  %v1787_v48 = vadd.f32 %v1736_v42, %v1692_v2  ;;  %v1796_v24 = vadd.f32 %v1788_v38, %v3214_v3  ;;  %v1694_v18 = vunpack.c.h.bf16 %v3857_v6 }
 0x5ed   :  { %v1738_v26 = vpop.f32.mrf.mxu0  ;;  %v1781_v9 = vpop.f32.mrf.mxu1  ;;  %v1698_v38 = vunpack.c.h.bf16 %v3859_v30 }
 0x5ee   :  { %v1802_v13 = vmul.f32 0.5, %v1794_v29  ;;  %v1795_v27 = vadd.f32 %v1787_v48, %v3193_v55  ;;  %v1790_v36 = vadd.f32 %v1738_v26, %v1695_v5  ;;  %v1792_v31 = vadd.f32 %v1781_v9, %v1697_v7 }
 0x5ef   :  { %v1740_v19 = vpop.f32.mrf.mxu0  ;;  %v1789_v42 = vadd.f32 %v1779_v22, %v1694_v18  ;;  %v1783_v32 = vpop.f32.mrf.mxu1 }
 0x5f0   :  { %2700 = vtanh.f32 %v1802_v13  ;;  %v1810_v15 = vmul.f32 0.5, %v1795_v27  ;;  %v1791_v8 = vadd.f32 %v1740_v19, %v1696_v28  ;;  %v1798_v4 = vadd.f32 %v1790_v36, %v3195_v17 }
 0x5f1   :  { %v1800_v48 = vadd.f32 %v1792_v31, %v3214_v3  ;;  %v1797_v5 = vadd.f32 %v1789_v42, %v3218_v59  ;;  %v1793_v26 = vadd.f32 %v1783_v32, %v1698_v38  ;;  %v1846_v42 = vpop.permute.xlu0 %1845 }
 0x5f2   :  { %2702 = vtanh.f32 %v1810_v15  ;;  %v1799_v16 = vadd.f32 %v1791_v8, %v3193_v55  ;;  %v1803_v2 = vmul.f32 0.5, %v1798_v4  ;;  %vm1850_vm12 = vcmp.eq.s32.totalorder %v1846_v42, 1 }
 0x5f3   :  { %2704 = vtanh.f32 %v1796_v24  ;;  %v1820_v13 = vmul.f32 0.5, %v1797_v5  ;;  %v1801_v6 = vadd.f32 %v1793_v26, %v3218_v59  ;;  %v1849_v26 = vpop.permute.xlu1 %1848 }
 0x5f4   :  { %v1811_v29 = vmul.f32 0.5, %v1799_v16  ;;  %2706 = vtanh.f32 %v1803_v2  ;;  %vm1851_vm13 = vcmp.eq.s32.totalorder %v1849_v26, 1 }
 0x5f5   :  { %v1821_v7 = vmul.f32 0.5, %v1801_v6 }
 0x5f6   :  { %2708 = vtanh.f32 %v1811_v29 }
 0x5f7   :  { %2710 = vtanh.f32 %v1800_v48 }
 0x5f8   :  { %2712 = vtanh.f32 %v1820_v13 }
 0x5f9   :  { %2714 = vtanh.f32 %v1821_v7 }
 0x5fd   :  { %v2701_v27 = vpop.eup %2700 }
 0x5fe   :  { %v1806_v9 = vadd.f32 1.0, %v2701_v27 }
 0x5ff   :  { %v2703_v28 = vpop.eup %2702 }
 0x600   :  { %v1808_v36 = vmul.f32 0.5, %v1806_v9  ;;  %v1814_v22 = vadd.f32 1.0, %v2703_v28  ;;  %v2705_v19 = vpop.eup %2704 }
 0x601   :  { %v2707_v24 = vpop.eup %2706 }
 0x602   :  { %v1816_v15 = vmul.f32 0.5, %v1814_v22  ;;  %v1830_v8 = vmul.f32 %v2705_v19, %v1808_v36  ;;  %v1807_v30 = vadd.f32 1.0, %v2707_v24 }
 0x603   :  { %v2709_v4 = vpop.eup %2708 }
 0x604   :  { %v1828_v31 = vmul.f32 %v1816_v15, %v3575_v21  ;;  %v1815_v18 = vadd.f32 1.0, %v2709_v4  ;;  %v1809_v16 = vmul.f32 0.5, %v1807_v30  ;;  %v2711_v2 = vpop.eup %2710 }
 0x605   :  { %v2713_v27 = vpop.eup %2712 }
 0x606   :  { %v1832_v29 = vadd.f32 %v1830_v8, %v1828_v31  ;;  %v1817_v48 = vmul.f32 0.5, %v1815_v18  ;;  %v1831_v32 = vmul.f32 %v2711_v2, %v1809_v16  ;;  %v1824_v9 = vadd.f32 1.0, %v2713_v27  ;;  %v2715_v28 = vpop.eup %2714 }
 0x607   :  { %v1825_v22 = vadd.f32 1.0, %v2715_v28 }
 0x608   :  { %2716 = vtanh.f32 %v1832_v29  ;;  %v1829_v38 = vmul.f32 %v1817_v48, %v3578_v1  ;;  %v3643_v5 = vsel %vm1850_vm12, %v1832_v29, %v3575_v21  ;;  %v1826_v36 = vmul.f32 0.5, %v1824_v9 }
 0x609   :  { %v1827_v24 = vmul.f32 0.5, %v1825_v22 }
 0x60a   :  { %v1833_v13 = vadd.f32 %v1831_v32, %v1829_v38 }
 0x60c   :  { %2718 = vtanh.f32 %v1833_v13  ;;  %v3646_v6 = vsel %vm1851_vm13, %v1833_v13, %v3578_v1 }
 0x615   :  { %v2717_v7 = vpop.eup %2716 }
 0x616   :  { %v1836_v19 = vmul.f32 %v2717_v7, %v1826_v36 }
 0x618   :  { %v3650_v21 = vsel %vm1850_vm12, %v1836_v19, %v3582_v57 }
 0x619   :  { %v2719_v15 = vpop.eup %2718 }
 0x61a   :  { %v1837_v8 = vmul.f32 %v2719_v15, %v1827_v24 }
 0x61c   :  { %v3653_v4 = vsel %vm1851_vm13, %v1837_v8, %v3585_v63 }
 0x61d   :  { %v1871_v1 = vpack.c.bf16 %v3653_v4, %v3650_v21 }
 0x61f   :  { %1905 = vmatmul.mubr.bf16.vlgmr.msra.gmra.mxu0 %v1871_v1  ;;  %1948 = vmatmul.mubr.bf16.vlgmr.msra.gmra.mxu1 %v1871_v1 }
 0x620   :  { %2045 = vmatpush1.bf16.msra.mxu0 %v3321_v58  ;;  %2088 = vmatpush1.bf16.msra.mxu1 %v3324_v52 }
 0x621   :  { %2046 = vmatprep.subr.bf16.mxu0 %v3327_v45  ;;  %2089 = vmatprep.subr.bf16.mxu1 %v3330_v25 }
 0x622   :  { %2076 = vmatprep.mubr.bf16.mxu0 %v3840_v50  ;;  %2119 = vmatprep.mubr.bf16.mxu1 %v3840_v50  ;;  %v3860_v50 = vld [vmem:[#allocation8_spill] sm:$0xff] }
 0x623   :  { %v1863_v58 = vunpack.c.l.bf16 %v3860_v50 }
 0x624   :  { %2047 = vmatpush1.bf16.msra.mxu0 %v3335_v56  ;;  %2090 = vmatpush1.bf16.msra.mxu1 %v3338_v34  ;;  %v3861_v56 = vld [vmem:[#allocation31_spill] sm:$0xff] }
 0x625   :  { %2048 = vmatprep.subr.bf16.mxu0 %v3341_v53  ;;  %2091 = vmatprep.subr.bf16.mxu1 %v3426_v20  ;;  %v1865_v34 = vunpack.c.l.bf16 %v3861_v56  ;;  %v1864_v53 = vunpack.c.h.bf16 %v3860_v50  ;;  %v3862_v20 = vld [vmem:[#allocation9_spill] sm:$0xff] }
 0x628   :  { %2049 = vmatpush1.bf16.msra.mxu0 %v3345_v33  ;;  %2092 = vmatpush1.bf16.msra.mxu1 %v3430_v0  ;;  %v1867_v0 = vunpack.c.l.bf16 %v3862_v20 }
 0x629   :  { %2050 = vmatprep.subr.bf16.mxu0 %v3349_v54  ;;  %2093 = vmatprep.subr.bf16.mxu1 %v3434_v35 }
 0x62c   :  { %2051 = vmatpush1.bf16.msra.mxu0 %v3353_v60  ;;  %2094 = vmatpush1.bf16.msra.mxu1 %v3438_v37 }
 0x62d   :  { %2052 = vmatprep.subr.bf16.mxu0 %v3357_v61  ;;  %2095 = vmatprep.subr.bf16.mxu1 %v3442_v40 }
 0x630   :  { %2053 = vmatpush1.bf16.msra.mxu0 %v3361_v23  ;;  %2096 = vmatpush1.bf16.msra.mxu1 %v3446_v39 }
 0x631   :  { %2054 = vmatprep.subr.bf16.mxu0 %v3449_v41  ;;  %2097 = vmatprep.subr.bf16.mxu1 %v3452_v43  ;;  %v1868_v41 = vunpack.c.h.bf16 %v3862_v20 }
 0x634   :  { %2055 = vmatpush1.bf16.msra.mxu0 %v3455_v44  ;;  %2098 = vmatpush1.bf16.msra.mxu1 %v3458_v46  ;;  %v3863_v44 = vld [vmem:[#allocation32_spill] sm:$0xff] }
 0x635   :  { %2056 = vmatprep.subr.bf16.mxu0 %v3461_v47  ;;  %2099 = vmatprep.subr.bf16.mxu1 %v3464_v49  ;;  %v1869_v46 = vunpack.c.l.bf16 %v3863_v44  ;;  %v1870_v16 = vunpack.c.h.bf16 %v3863_v44  ;;  %v2592_v44 = vld [vmem:[%s3781_s5 + $0x38] sm:$0xff]  }
 0x638   :  { %2057 = vmatpush1.bf16.msra.mxu0 %v3467_v51  ;;  %2100 = vmatpush1.bf16.msra.mxu1 %v3470_v11 }
 0x639   :  { %2058 = vmatprep.subr.bf16.mxu0 %v3473_v62  ;;  %2101 = vmatprep.subr.bf16.mxu1 %v3476_v10 }
 0x63c   :  { %2059 = vmatpush1.bf16.msra.mxu0 %v3479_v12  ;;  %2102 = vmatpush1.bf16.msra.mxu1 %v3482_v14  ;;  %v1866_v12 = vunpack.c.h.bf16 %v3861_v56 }
 0x6df   :  { %v1906_v52 = vpop.f32.mrf.mxu0  ;;  %v1949_v45 = vpop.f32.mrf.mxu1 }
 0x6e0   :  { %v1958_v25 = vadd.f32 %v1906_v52, %v1863_v58  ;;  %v1960_v61 = vadd.f32 %v1949_v45, %v1865_v34  ;;  %v2018_v58 = vpop.permute.xlu0 %2017 }
 0x6e1   :  { %v1908_v33 = vpop.f32.mrf.mxu0  ;;  %v1951_v54 = vpop.f32.mrf.mxu1  ;;  %vm2022_vm14 = vcmp.eq.s32.totalorder %v2018_v58, 1 }
 0x6e2   :  { %v1966_v60 = vadd.f32 %v1958_v25, %v3195_v17  ;;  %v1959_v23 = vadd.f32 %v1908_v33, %v1864_v53  ;;  %v1968_v49 = vadd.f32 %v1960_v61, %v3214_v3  ;;  %v1961_v63 = vadd.f32 %v1951_v54, %v1866_v12  ;;  %v2021_v53 = vpop.permute.xlu1 %2020 }
 0x6e3   :  { %v1910_v35 = vpop.f32.mrf.mxu0  ;;  %v1953_v39 = vpop.f32.mrf.mxu1  ;;  %vm2023_vm15 = vcmp.eq.s32.totalorder %v2021_v53, 1 }
 0x6e4   :  { %v1974_v37 = vmul.f32 0.5, %v1966_v60  ;;  %v1967_v40 = vadd.f32 %v1959_v23, %v3193_v55  ;;  %v1962_v43 = vadd.f32 %v1910_v35, %v1867_v0  ;;  %v1964_v10 = vadd.f32 %v1953_v39, %v1869_v46 }
 0x6e5   :  { %v1912_v47 = vpop.f32.mrf.mxu0  ;;  %v1955_v18 = vpop.f32.mrf.mxu1  ;;  %v1969_v2 = vadd.f32 %v1961_v63, %v3218_v59  ;;  %v2819_v46 = vmov 0.0  }
 0x6e6   :  { %2720 = vtanh.f32 %v1974_v37  ;;  %v1982_v51 = vmul.f32 0.5, %v1967_v40  ;;  %v1963_v11 = vadd.f32 %v1912_v47, %v1868_v41  ;;  %v1970_v62 = vadd.f32 %v1962_v43, %v3195_v17  ;;  %2499 = vmatprep.subr.bf16.mxu0 %v2819_v46  ;;  %v2595_v47 = vld [vmem:[%s3781_s5 + $0x20] sm:$0xff]  }
 0x6e7   :  { %v1972_v31 = vadd.f32 %v1964_v10, %v3214_v3  ;;  %v1965_v42 = vadd.f32 %v1955_v18, %v1870_v16  ;;  %v1992_v29 = vmul.f32 0.5, %v1969_v2  ;;  %v3864_v10 = vld [vmem:[#allocation10_spill] sm:$0xff] }
 0x6e8   :  { %2722 = vtanh.f32 %v1982_v51  ;;  %v1971_v14 = vadd.f32 %v1963_v11, %v3193_v55  ;;  %v1975_v57 = vmul.f32 0.5, %v1970_v62  ;;  %v2597_v51 = vld [vmem:[%s3781_s5 + $0x10] sm:$0xff]   ;;  %v2598_v11 = vld [vmem:[%s3781_s5 + $0x8] sm:$0xff]   ;;  %v2599_v62 = vld [vmem:[%s3781_s5] sm:$0xff]   ;;  %v2035_v12 = vunpack.c.l.bf16 %v3864_v10 }
 0x6e9   :  { %2724 = vtanh.f32 %v1968_v49  ;;  %v1973_v48 = vadd.f32 %v1965_v42, %v3218_v59  ;;  %v2596_v49 = vld [vmem:[%s3781_s5 + $0x18] sm:$0xff]   ;;  %v2036_v18 = vunpack.c.h.bf16 %v3864_v10 }
 0x6ea   :  { %v1983_v30 = vmul.f32 0.5, %v1971_v14  ;;  %2726 = vtanh.f32 %v1975_v57 }
 0x6eb   :  { %v1993_v9 = vmul.f32 0.5, %v1973_v48 }
 0x6ec   :  { %2728 = vtanh.f32 %v1983_v30  ;;  %v3865_v30 = vld [vmem:[#allocation33_spill] sm:$0xff] }
 0x6ed   :  { %2730 = vtanh.f32 %v1972_v31  ;;  %v2037_v31 = vunpack.c.l.bf16 %v3865_v30  ;;  %v2038_v58 = vunpack.c.h.bf16 %v3865_v30 }
 0x6ee   :  { %2732 = vtanh.f32 %v1992_v29 }
 0x6ef   :  { %2734 = vtanh.f32 %v1993_v9 }
 0x6f3   :  { %v2721_v32 = vpop.eup %2720 }
 0x6f4   :  { %v1978_v38 = vadd.f32 1.0, %v2721_v32  ;;  %v3866_v32 = vld [vmem:[#allocation12_spill] sm:$0xff] }
 0x6f5   :  { %v2723_v26 = vpop.eup %2722 }
 0x6f6   :  { %v1980_v13 = vmul.f32 0.5, %v1978_v38  ;;  %v1986_v27 = vadd.f32 1.0, %v2723_v26  ;;  %v2725_v28 = vpop.eup %2724  ;;  %v2039_v38 = vunpack.c.l.bf16 %v3866_v32 }
 0x6f7   :  { %v2727_v36 = vpop.eup %2726 }
 0x6f8   :  { %v1988_v22 = vmul.f32 0.5, %v1986_v27  ;;  %v2002_v7 = vmul.f32 %v2725_v28, %v1980_v13  ;;  %v1979_v24 = vadd.f32 1.0, %v2727_v36  ;;  %v2040_v28 = vunpack.c.h.bf16 %v3866_v32 }
 0x6f9   :  { %v2729_v19 = vpop.eup %2728 }
 0x6fa   :  { %v2000_v15 = vmul.f32 %v1988_v22, %v3643_v5  ;;  %v1987_v8 = vadd.f32 1.0, %v2729_v19  ;;  %v1981_v1 = vmul.f32 0.5, %v1979_v24  ;;  %v2731_v50 = vpop.eup %2730  ;;  %v3867_v22 = vld [vmem:[#allocation34_spill] sm:$0xff] }
 0x6fb   :  { %v2733_v60 = vpop.eup %2732 }
 0x6fc   :  { %v2004_v52 = vadd.f32 %v2002_v7, %v2000_v15  ;;  %v1989_v45 = vmul.f32 0.5, %v1987_v8  ;;  %v2003_v25 = vmul.f32 %v2731_v50, %v1981_v1  ;;  %v1996_v61 = vadd.f32 1.0, %v2733_v60  ;;  %v2735_v23 = vpop.eup %2734 }
 0x6fd   :  { %v1997_v0 = vadd.f32 1.0, %v2735_v23  ;;  %v2041_v7 = vunpack.c.l.bf16 %v3867_v22  ;;  %v2042_v60 = vunpack.c.h.bf16 %v3867_v22 }
 0x6fe   :  { %2736 = vtanh.f32 %v2004_v52  ;;  %v2001_v56 = vmul.f32 %v1989_v45, %v3646_v6  ;;  %v3709_v34 = vsel %vm2022_vm14, %v2004_v52, %v3643_v5  ;;  %v1998_v20 = vmul.f32 0.5, %v1996_v61 }
 0x6ff   :  { %v1999_v40 = vmul.f32 0.5, %v1997_v0 }
 0x700   :  { %v2005_v33 = vadd.f32 %v2003_v25, %v2001_v56 }
 0x702   :  { %2738 = vtanh.f32 %v2005_v33  ;;  %v3712_v54 = vsel %vm2023_vm15, %v2005_v33, %v3646_v6 }
 0x70b   :  { %v2737_v35 = vpop.eup %2736 }
 0x70c   :  { %v2008_v37 = vmul.f32 %v2737_v35, %v1998_v20 }
 0x70e   :  { %v3716_v5 = vsel %vm2022_vm14, %v2008_v37, %v3650_v21  ;;  %v2593_v21 = vld [vmem:[%s3781_s5 + $0x30] sm:$0xff]  }
 0x70f   :  { %v2739_v39 = vpop.eup %2738 }
 0x710   :  { %v2009_v41 = vmul.f32 %v2739_v39, %v1999_v40 }
 0x712   :  { %v3719_v43 = vsel %vm2023_vm15, %v2009_v41, %v3653_v4  ;;  %v2594_v4 = vld [vmem:[%s3781_s5 + $0x28] sm:$0xff]  }
 0x713   :  { %v2043_v6 = vpack.c.bf16 %v3719_v43, %v3716_v5 }
 0x715   :  { %2077 = vmatmul.mubr.bf16.vlgmr.msra.gmra.mxu0 %v2043_v6  ;;  %2120 = vmatmul.mubr.bf16.vlgmr.msra.gmra.mxu1 %v2043_v6 }
 0x716   :  { %2500 = vmatpush3.bf16.msra.mxu0 %v2592_v44  ;;  %2515 = vmatprep.mubr.msk.bf16.mxu0 %vm2820_vm0, %v2819_v46 }
 0x717   :  { %2501 = vmatprep.subr.bf16.mxu0 %v2819_v46 }
 0x71a   :  { %2502 = vmatpush3.bf16.msra.mxu0 %v2593_v21 }
 0x71b   :  { %2503 = vmatprep.subr.bf16.mxu0 %v2819_v46 }
 0x71e   :  { %2504 = vmatpush3.bf16.msra.mxu0 %v2594_v4 }
 0x71f   :  { %2505 = vmatprep.subr.bf16.mxu0 %v2819_v46 }
 0x722   :  { %2506 = vmatpush3.bf16.msra.mxu0 %v2595_v47 }
 0x723   :  { %2507 = vmatprep.subr.bf16.mxu0 %v2819_v46 }
 0x726   :  { %2508 = vmatpush3.bf16.msra.mxu0 %v2596_v49 }
 0x727   :  { %2509 = vmatprep.subr.bf16.mxu0 %v2819_v46 }
 0x72a   :  { %2510 = vmatpush3.bf16.msra.mxu0 %v2597_v51 }
 0x72b   :  { %2511 = vmatprep.subr.bf16.mxu0 %v2819_v46 }
 0x72e   :  { %2512 = vmatpush3.bf16.msra.mxu0 %v2598_v11 }
 0x72f   :  { %2513 = vmatprep.subr.bf16.mxu0 %v2819_v46 }
 0x732   :  { %2514 = vmatpush3.bf16.msra.mxu0 %v2599_v62 }
 0x7d5   :  { %v2078_v14 = vpop.f32.mrf.mxu0  ;;  %v2121_v57 = vpop.f32.mrf.mxu1 }
 0x7d6   :  { %v2130_v63 = vadd.f32 %v2078_v14, %v2035_v12  ;;  %v2132_v29 = vadd.f32 %v2121_v57, %v2037_v31 }
 0x7d7   :  { %v2080_v16 = vpop.f32.mrf.mxu0  ;;  %v2123_v2 = vpop.f32.mrf.mxu1 }
 0x7d8   :  { %v2138_v42 = vadd.f32 %v2130_v63, %v3195_v17  ;;  %v2131_v48 = vadd.f32 %v2080_v16, %v2036_v18  ;;  %v2140_v24 = vadd.f32 %v2132_v29, %v3214_v3  ;;  %v2133_v25 = vadd.f32 %v2123_v2, %v2038_v58  ;;  %v2193_v2 = vpop.permute.xlu1 %2192 }
 0x7d9   :  { %v2082_v26 = vpop.f32.mrf.mxu0  ;;  %v2125_v9 = vpop.f32.mrf.mxu1  ;;  %vm2195_vm2 = vcmp.eq.s32.totalorder %v2193_v2, 1 }
 0x7da   :  { %v2146_v13 = vmul.f32 0.5, %v2138_v42  ;;  %v2139_v27 = vadd.f32 %v2131_v48, %v3193_v55  ;;  %v2134_v36 = vadd.f32 %v2082_v26, %v2039_v38  ;;  %v2136_v50 = vadd.f32 %v2125_v9, %v2041_v7  ;;  %v2443_v26 = vld [vmem:[%s3782_s6] ss:$0 sm:$0xff] }
 0x7db   :  { %v2084_v19 = vpop.f32.mrf.mxu0  ;;  %v2127_v33 = vpop.f32.mrf.mxu1  ;;  %v2141_v61 = vadd.f32 %v2133_v25, %v3218_v59 }
 0x7dc   :  { %2740 = vtanh.f32 %v2146_v13  ;;  %v2154_v15 = vmul.f32 0.5, %v2139_v27  ;;  %v2135_v8 = vadd.f32 %v2084_v19, %v2040_v28  ;;  %v2142_v1 = vadd.f32 %v2134_v36, %v3195_v17 }
 0x7dd   :  { %v2144_v53 = vadd.f32 %v2136_v50, %v3214_v3  ;;  %v2137_v17 = vadd.f32 %v2127_v33, %v2042_v60  ;;  %v2164_v23 = vmul.f32 0.5, %v2141_v61 }
 0x7de   :  { %2742 = vtanh.f32 %v2154_v15  ;;  %v2143_v52 = vadd.f32 %v2135_v8, %v3193_v55  ;;  %v2147_v45 = vmul.f32 0.5, %v2142_v1 }
 0x7df   :  { %2744 = vtanh.f32 %v2140_v24  ;;  %v2145_v20 = vadd.f32 %v2137_v17, %v3218_v59 }
 0x7e0   :  { %v2155_v56 = vmul.f32 0.5, %v2143_v52  ;;  %2746 = vtanh.f32 %v2147_v45 }
 0x7e1   :  { %v2165_v39 = vmul.f32 0.5, %v2145_v20 }
 0x7e2   :  { %2748 = vtanh.f32 %v2155_v56 }
 0x7e3   :  { %2750 = vtanh.f32 %v2144_v53 }
 0x7e4   :  { %2752 = vtanh.f32 %v2164_v23 }
 0x7e5   :  { %2754 = vtanh.f32 %v2165_v39 }
 0x7e9   :  { %v2741_v0 = vpop.eup %2740 }
 0x7ea   :  { %v2150_v55 = vadd.f32 1.0, %v2741_v0 }
 0x7eb   :  { %v2743_v35 = vpop.eup %2742 }
 0x7ec   :  { %v2152_v37 = vmul.f32 0.5, %v2150_v55  ;;  %v2158_v40 = vadd.f32 1.0, %v2743_v35  ;;  %v2745_v41 = vpop.eup %2744 }
 0x7ed   :  { %v2747_v3 = vpop.eup %2746 }
 0x7ee   :  { %v2160_v6 = vmul.f32 0.5, %v2158_v40  ;;  %v2174_v44 = vmul.f32 %v2745_v41, %v2152_v37  ;;  %v2151_v21 = vadd.f32 1.0, %v2747_v3 }
 0x7ef   :  { %v2749_v46 = vpop.eup %2748 }
 0x7f0   :  { %v2172_v4 = vmul.f32 %v2160_v6, %v3709_v34  ;;  %v2159_v47 = vadd.f32 1.0, %v2749_v46  ;;  %v2153_v49 = vmul.f32 0.5, %v2151_v21  ;;  %v2751_v51 = vpop.eup %2750  ;;  %v2190_v34 = vpop.permute.xlu0 %2189 }
 0x7f1   :  { %v2753_v14 = vpop.eup %2752  ;;  %vm2194_vm1 = vcmp.eq.s32.totalorder %v2190_v34, 1 }
 0x7f2   :  { %v2176_v59 = vadd.f32 %v2174_v44, %v2172_v4  ;;  %v2161_v11 = vmul.f32 0.5, %v2159_v47  ;;  %v2175_v62 = vmul.f32 %v2751_v51, %v2153_v49  ;;  %v2168_v57 = vadd.f32 1.0, %v2753_v14  ;;  %v2755_v63 = vpop.eup %2754 }
 0x7f3   :  { %v2169_v31 = vadd.f32 1.0, %v2755_v63 }
 0x7f4   :  { %2756 = vtanh.f32 %v2176_v59  ;;  %v2173_v10 = vmul.f32 %v2161_v11, %v3712_v54  ;;  %v2170_v30 = vmul.f32 0.5, %v2168_v57 }
 0x7f5   :  { %v2171_v42 = vmul.f32 0.5, %v2169_v31 }
 0x7f6   :  { %v2177_v12 = vadd.f32 %v2175_v62, %v2173_v10 }
 0x7f8   :  { %2758 = vtanh.f32 %v2177_v12 }
 0x801   :  { %v2757_v18 = vpop.eup %2756 }
 0x802   :  { %v2180_v16 = vmul.f32 %v2757_v18, %v2170_v30 }
 0x804   :  { %v2196_v32 = vsel %vm2194_vm1, %v2180_v16, %v3716_v5 }
 0x805   :  { %v2759_v29 = vpop.eup %2758 }
 0x806   :  { %v2181_v48 = vmul.f32 %v2759_v29, %v2171_v42 }
 0x808   :  { %v2197_v54 = vsel %vm2195_vm2, %v2181_v48, %v3719_v43 }
 0x809   :  { %v2207_v38 = vpack.c.bf16 %v2197_v54, %v2196_v32 }
 0x80b   :  { %2516 = vmatmul.mubr.bf16.vlgmr.msra.gmra.mxu0 %v2207_v38 }
 0x8cb   :  { %v2313_v13 = vpop.f32.mrf.mxu0 }
 0x8cc   :  { %v2314_v27 = vadd.f32 %v2443_v26, %v2313_v13 }
 0x8cd   :  { %v2517_v9 = vpop.f32.mrf.mxu0 }
 0x8ce   :  { %2321 = vst.msk [vmem:[%s3783_s7] sm:$0xff] %vm2320_vm3, %v2314_v27 }
 0x8cf   :  { %v2316_v28 = vpop.f32.mrf.mxu0 }
 0x8d0   :  { %v2317_v36 = vadd.f32 %v2443_v26, %v2316_v28 }
 0x8d1   :  { %v2518_v22 = vpop.f32.mrf.mxu0 }
 0x8d2   :  { %2322 = vst.msk [vmem:[%s3783_s7 + $0x8] sm:$0xff] %vm2320_vm3, %v2317_v36 }
 0x8d3   :  { %2327 = vsyncpa [#allocation6], 1 }

</bundles_post_ra>
